<compile_context>
chip_gen: v7x
topology: tpu7x:2x2x1
jax: 0.10.0
libtpu: 0.0.40
codegen_flags: <defaults>
</compile_context>

<pallas_src>
import math
import numpy as np
import jax
import jax.numpy as jnp
from jax import lax
from jax.experimental import pallas as pl
from jax.experimental.pallas import tpu as pltpu

# ----------------------------- config ----------------------------------------
N_ITEMS = 20
EMB_DIM = 32        # args.embedding_dim == args.hidden_size
MAXLEN = 8          # args.maxlen
N_LAYERS = 1        # args.n_layers (GNN steps AND transformer layers)
N_HEADS = 2         # args.n_heads
LAMB = 0.4          # args.lamb
LN_EPS = 1e-5
NEG_INF = -1e9


# --------------------------- fused Pallas kernel ------------------------------

def _layernorm(x, g, b):
    mu = jnp.mean(x, axis=-1, keepdims=True)
    var = jnp.mean((x - mu) ** 2, axis=-1, keepdims=True)
    return (x - mu) * lax.rsqrt(var + LN_EPS) * g + b


def make_fused_kernel(B, L, D, n_layers, n_heads):
    """Whole GCSAN forward (post-embedding) for the full batch, one invocation."""
    BL = B * L
    Dh = D // n_heads
    scale = 1.0 / math.sqrt(Dh)
    n_fixed = 12
    f32 = jnp.float32

    def kernel(*refs):
        (hid_ref, A_bd_ref, G_bd_ref, pos_ref, pad_ref, mask_ref, last_ref,
         gnn_w1_ref, gnn_b1_ref, gnn_w2_ref, gnn_b2_ref, lnf_ref) = refs[:n_fixed]
        layer_refs = refs[n_fixed:-1]
        out_ref = refs[-1]

        # ---------------- GNN (SR-GNN gated cell), batch flattened to (BL, D) --
        A_bd = A_bd_ref[...]                    # (BL, 2BL) block-diag [A_in | A_out]
        A_in = A_bd[:, :BL]
        A_out = A_bd[:, BL:]
        w1 = gnn_w1_ref[...]                    # (D, 5D)  = [w_ein | w_eout | w_hh]
        b1 = gnn_b1_ref[...]                    # (1, 5D)  = [b_ein | b_eout | b_hh]
        w2 = gnn_w2_ref[...]                    # (2D, 3D) = [w_ih_in ; w_ih_out]
        b2 = gnn_b2_ref[...]                    # (1, 5D)  = [b_iah | b_ioh | b_ih]
        h = hid_ref[...]                        # (BL, D)

        for _ in range(n_layers):
            proj = jnp.dot(h, w1, preferred_element_type=f32) + b1      # (BL, 5D)
            h_in = proj[:, :D]
            h_out = proj[:, D:2 * D]
            gh = proj[:, 2 * D:]                                        # h @ w_hh + b_hh
            inp_in = jnp.dot(A_in, h_in, preferred_element_type=f32) + b2[:, :D]
            inp_out = jnp.dot(A_out, h_out, preferred_element_type=f32) + b2[:, D:2 * D]
            gi = (jnp.dot(inp_in, w2[:D], preferred_element_type=f32)
                  + jnp.dot(inp_out, w2[D:], preferred_element_type=f32)
                  + b2[:, 2 * D:])                                      # (BL, 3D)
            i_r, i_i, i_n = gi[:, :D], gi[:, D:2 * D], gi[:, 2 * D:]
            h_r, h_i, h_n = gh[:, :D], gh[:, D:2 * D], gh[:, 2 * D:]
            resetgate = jax.nn.sigmoid(i_r + h_r)
            inputgate = jax.nn.sigmoid(i_i + h_i)
            newgate = jnp.tanh(i_n + resetgate * h_n)
            h = newgate + inputgate * (h - newgate)

        # ------- alias gather / last-item gather as one-hot matmuls ------------
        seq_hidden = jnp.dot(G_bd_ref[...], h, preferred_element_type=f32)   # (BL, D)
        last_oh = last_ref[...]                                              # (B, BL)
        ht = jnp.dot(last_oh, seq_hidden, preferred_element_type=f32)        # (B, D)

        pad = pad_ref[...]                                                   # (BL, 1)
        mask = mask_ref[...]                                                 # (B, L, L) additive
        x = seq_hidden + pos_ref[...]                                        # + positional emb

        # ---------------- transformer encoder layers ---------------------------
        # TODO(synk): exact custom TransformerEncoder internals were not provided;
        # a SASRec-style pre-LN encoder with causal + key-padding masking is used.
        for li in range(n_layers):
            (ln_ref, wqkv_ref, bqkv_ref, wo_ref, bo_ref,
             wffn_ref, bffn_ref) = layer_refs[7 * li: 7 * li + 7]
            ln = ln_ref[...]                    # (4, D): ln1_g, ln1_b, ln2_g, ln2_b
            wqkv = wqkv_ref[...]                # (D, 3D) = [wq | wk | wv]
            bqkv = bqkv_ref[...]                # (1, 3D)

            x = x * pad
            q_in = _layernorm(x, ln[0:1], ln[1:2])
            Q = jnp.dot(q_in, wqkv[:, :D], preferred_element_type=f32) + bqkv[:, :D]
            KV = jnp.dot(x, wqkv[:, D:], preferred_element_type=f32) + bqkv[:, D:]

            Q3 = Q.reshape(B, L, D)
            K3 = KV[:, :D].reshape(B, L, D)
            V3 = KV[:, D:].reshape(B, L, D)

            heads = []
            for hh in range(n_heads):           # static unroll; batched over B via einsum
                lo, hi = hh * Dh, (hh + 1) * Dh
                s = jnp.einsum('bqd,bkd->bqk', Q3[:, :, lo:hi], K3[:, :, lo:hi],
                               preferred_element_type=f32)
                s = s * scale + mask
                s = s - jnp.max(s, axis=-1, keepdims=True)
                p = jnp.exp(s)
                p = p * pl.reciprocal(jnp.sum(p, axis=-1, keepdims=True), approx=True)
                heads.append(jnp.einsum('bqk,bkd->bqd', p, V3[:, :, lo:hi],
                                        preferred_element_type=f32))
            attn = jnp.concatenate(heads, axis=-1).reshape(BL, D)
            attn = jnp.dot(attn, wo_ref[...], preferred_element_type=f32) + bo_ref[...]

            x = q_in + attn                      # attention residual
            y = _layernorm(x, ln[2:3], ln[3:4])
            wffn = wffn_ref[...]                 # (2D, D) = [w1 ; w2]
            bffn = bffn_ref[...]                 # (2, D)  = [b1 ; b2]
            f = jnp.maximum(jnp.dot(y, wffn[:D], preferred_element_type=f32) + bffn[0:1], 0.0)
            f = jnp.dot(f, wffn[D:], preferred_element_type=f32) + bffn[1:2]
            x = y + f                            # FFN residual
            x = x * pad

        # ------------------ final LN, last-item gather, mix --------------------
        lnf = lnf_ref[...]                       # (2, D)
        xf = _layernorm(x, lnf[0:1], lnf[1:2])
        out = jnp.dot(last_oh, xf, preferred_element_type=f32)               # (B, D)
        out_ref[...] = LAMB * out + (1.0 - LAMB) * ht

    return kernel


# ----------------------------- parameters ------------------------------------

def init_params(key):
    stdv = 1.0 / math.sqrt(EMB_DIM)   # _init_weights: uniform(-stdv, stdv) for everything
    D = EMB_DIM
    keys = iter(jax.random.split(key, 64))

    def uni(shape):
        return jax.random.uniform(next(keys), shape, jnp.float32, -stdv, stdv)

    params = {
        'item_emb': uni((N_ITEMS, D)),
        'pos_emb': uni((MAXLEN, D)),
        # GNN
        'w_ein': uni((D, D)), 'b_ein': uni((1, D)),
        'w_eout': uni((D, D)), 'b_eout': uni((1, D)),
        'b_iah': uni((1, D)), 'b_ioh': uni((1, D)),
        'w_ih_in': uni((D, 3 * D)), 'w_ih_out': uni((D, 3 * D)), 'b_ih': uni((1, 3 * D)),
        'w_hh': uni((D, 3 * D)), 'b_hh': uni((1, 3 * D)),
        # final layernorm of the transformer encoder
        'lnf_g': uni((D,)), 'lnf_b': uni((D,)),
        'trm': [],
    }
    for _ in range(N_LAYERS):
        params['trm'].append({
            'ln1_g': uni((1, D)), 'ln1_b': uni((1, D)),
            'wq': uni((D, D)), 'bq': uni((1, D)),
            'wk': uni((D, D)), 'bk': uni((1, D)),
            'wv': uni((D, D)), 'bv': uni((1, D)),
            'wo': uni((D, D)), 'bo': uni((1, D)),
            'ln2_g': uni((1, D)), 'ln2_b': uni((1, D)),
            'w1': uni((D, D)), 'b1': uni((1, D)),
            'w2': uni((D, D)), 'b2': uni((1, D)),
        })
    return params


# ------------------------- host graph construction ---------------------------
# Faithful port of GCSAN._get_slice (data-dependent numpy loops stay on host,
# exactly as the PyTorch code does via .cpu().numpy()).

def get_slice_np(seqs):
    B, L = seqs.shape
    items, A, alias = [], [], []
    for seq in seqs:
        node = np.unique(seq)
        items.append(node.tolist() + (L - len(node)) * [0])
        u_A = np.zeros((L, L))
        for i in np.arange(len(seq) - 1):
            if seq[i + 1] == 0:
                break
            u = np.where(node == seq[i])[0][0]
            v = np.where(node == seq[i + 1])[0][0]
            u_A[u][v] = 1
        u_sum_in = np.sum(u_A, 0)
        u_sum_in[np.where(u_sum_in == 0)] = 1
        u_A_in = np.divide(u_A, u_sum_in)
        u_sum_out = np.sum(u_A, 1)
        u_sum_out[np.where(u_sum_out == 0)] = 1
        u_A_out = np.divide(u_A.transpose(), u_sum_out)
        A.append(np.concatenate([u_A_in, u_A_out]).transpose())
        alias.append([np.where(node == i)[0][0] for i in seq])
    return (np.array(alias, dtype=np.int32),
            np.array(A, dtype=np.float32),
            np.array(items, dtype=np.int32))


# ------------------------------ forward ---------------------------------------

def _block_diag(mats, eyeB):
    """(B, L, L) per-sample matrices -> (B*L, B*L) block-diagonal."""
    B, L, _ = mats.shape
    return jnp.einsum('bij,bc->bicj', mats, eyeB).reshape(B * L, B * L)


@jax.jit
def _device_forward(params, items, A, alias, seqs, lens):
    B, L = seqs.shape
    D = EMB_DIM
    BL = B * L
    p = params

    # ----- pack weights into a few slabs (fewer, larger DMAs into the kernel) --
    gnn_w1 = jnp.concatenate([p['w_ein'], p['w_eout'], p['w_hh']], axis=1)    # (D, 5D)
    gnn_b1 = jnp.concatenate([p['b_ein'], p['b_eout'], p['b_hh']], axis=1)    # (1, 5D)
    gnn_w2 = jnp.concatenate([p['w_ih_in'], p['w_ih_out']], axis=0)           # (2D, 3D)
    gnn_b2 = jnp.concatenate([p['b_iah'], p['b_ioh'], p['b_ih']], axis=1)     # (1, 5D)
    lnf_gb = jnp.stack([p['lnf_g'], p['lnf_b']], axis=0)                      # (2, D)
    layer_args = []
    for lp in p['trm']:
        ln_gb = jnp.concatenate([lp['ln1_g'], lp['ln1_b'], lp['ln2_g'], lp['ln2_b']], axis=0)
        w_qkv = jnp.concatenate([lp['wq'], lp['wk'], lp['wv']], axis=1)       # (D, 3D)
        b_qkv = jnp.concatenate([lp['bq'], lp['bk'], lp['bv']], axis=1)       # (1, 3D)
        w_ffn = jnp.concatenate([lp['w1'], lp['w2']], axis=0)                 # (2D, D)
        b_ffn = jnp.concatenate([lp['b1'], lp['b2']], axis=0)                 # (2, D)
        layer_args += [ln_gb, w_qkv, b_qkv, lp['wo'], lp['bo'], w_ffn, b_ffn]

    # ----- dense inputs: gathers turned into one-hot / block-diag matmuls ------
    hidden0 = jnp.take(p['item_emb'], items, axis=0).reshape(BL, D)
    eyeB = jnp.eye(B, dtype=jnp.float32)
    A_in_bd = _block_diag(A[:, :, :L], eyeB)
    A_out_bd = _block_diag(A[:, :, L:], eyeB)
    A_bd = jnp.concatenate([A_in_bd, A_out_bd], axis=1)                       # (BL, 2BL)
    G_bd = _block_diag(jax.nn.one_hot(alias, L, dtype=jnp.float32), eyeB)     # (BL, BL)
    pos_tiled = jnp.tile(p['pos_emb'][:L], (B, 1))                            # (BL, D)

    valid = seqs > 0
    pad = valid.astype(jnp.float32).reshape(BL, 1)
    row = jnp.arange(L)[:, None]
    col = jnp.arange(L)[None, :]
    causal = col <= row                                                       # unidirectional
    allowed = jnp.logical_and(causal[None, :, :], valid[:, None, :])          # key padding mask
    attn_mask = jnp.where(allowed, 0.0, NEG_INF).astype(jnp.float32)          # (B, L, L) additive
    last_oh = jax.nn.one_hot(jnp.arange(B) * L + (lens - 1), BL,
                             dtype=jnp.float32)                               # (B, BL)

    args = [hidden0, A_bd, G_bd, pos_tiled, pad, attn_mask, last_oh,
            gnn_w1, gnn_b1, gnn_w2, gnn_b2, lnf_gb] + layer_args

    kernel = make_fused_kernel(B, L, D, N_LAYERS, N_HEADS)
    return pl.pallas_call(
        kernel,
        out_shape=jax.ShapeDtypeStruct((B, D), jnp.float32),
        in_specs=[pl.BlockSpec(memory_space=pltpu.MemorySpace.VMEM)] * len(args),
        out_specs=pl.BlockSpec(memory_space=pltpu.MemorySpace.VMEM),
    )(*args)


def gcsan_forward(seqs_np, lens_np, params):
    alias, A, items = get_slice_np(seqs_np)
    return _device_forward(params,
                           jnp.asarray(items),
                           jnp.asarray(A),
                           jnp.asarray(alias),
                           jnp.asarray(seqs_np, dtype=jnp.int32),
                           jnp.asarray(lens_np, dtype=jnp.int32))


# -------------------------------- main ----------------------------------------

if __name__ == "__main__":
    key = jax.random.PRNGKey(0)
    params = init_params(key)

    # deterministic small batch: padding (item id 0) at the end of each session
    seqs = np.array([[3, 5, 3, 7, 0, 0, 0, 0],
                     [2, 9, 4, 0, 0, 0, 0, 0]], dtype=np.int32)   # (B=2, L=MAXLEN=8)
    lens = np.array([4, 3], dtype=np.int32)

    out = gcsan_forward(seqs, lens, params)
    out = jax.block_until_ready(out)
    assert out.shape == (2, EMB_DIM)
    assert bool(jnp.all(jnp.isfinite(out)))
    print("KERNEL_OK")
</pallas_src>

<mosaic_0001>
module attributes {stable_mosaic.version = 11 : i64} {
  func.func @kernel(%arg0: memref<16x32xf32, #tpu.memory_space<vmem>>, %arg1: memref<16x32xf32, #tpu.memory_space<vmem>>, %arg2: memref<16x16xf32, #tpu.memory_space<vmem>>, %arg3: memref<16x32xf32, #tpu.memory_space<vmem>>, %arg4: memref<16x1xf32, #tpu.memory_space<vmem>>, %arg5: memref<2x8x8xf32, #tpu.memory_space<vmem>>, %arg6: memref<2x16xf32, #tpu.memory_space<vmem>>, %arg7: memref<32x160xf32, #tpu.memory_space<vmem>>, %arg8: memref<1x160xf32, #tpu.memory_space<vmem>>, %arg9: memref<64x96xf32, #tpu.memory_space<vmem>>, %arg10: memref<1x160xf32, #tpu.memory_space<vmem>>, %arg11: memref<2x32xf32, #tpu.memory_space<vmem>>, %arg12: memref<4x32xf32, #tpu.memory_space<vmem>>, %arg13: memref<32x96xf32, #tpu.memory_space<vmem>>, %arg14: memref<1x96xf32, #tpu.memory_space<vmem>>, %arg15: memref<32x32xf32, #tpu.memory_space<vmem>>, %arg16: memref<1x32xf32, #tpu.memory_space<vmem>>, %arg17: memref<64x32xf32, #tpu.memory_space<vmem>>, %arg18: memref<2x32xf32, #tpu.memory_space<vmem>>, %arg19: memref<2x32xf32, #tpu.memory_space<vmem>>) attributes {dimension_semantics = [], scalar_prefetch = 0 : i64, scratch_operands = 0 : i64, tpu.core_type = #tpu.core_type<tc>} {
    %c0 = arith.constant 0 : index
    %c0_0 = arith.constant 0 : index
    %0 = vector.load %arg1[%c0, %c0_0] : memref<16x32xf32, #tpu.memory_space<vmem>>, vector<16x32xf32>
    %1 = vector.extract_strided_slice %0 {offsets = [0, 0], sizes = [16, 16], strides = [1, 1]} : vector<16x32xf32> to vector<16x16xf32>
    %2 = vector.extract_strided_slice %0 {offsets = [0, 16], sizes = [16, 16], strides = [1, 1]} : vector<16x32xf32> to vector<16x16xf32>
    %c0_1 = arith.constant 0 : index
    %c0_2 = arith.constant 0 : index
    %3 = vector.load %arg7[%c0_1, %c0_2] : memref<32x160xf32, #tpu.memory_space<vmem>>, vector<32x160xf32>
    %c0_3 = arith.constant 0 : index
    %c0_4 = arith.constant 0 : index
    %4 = vector.load %arg8[%c0_3, %c0_4] : memref<1x160xf32, #tpu.memory_space<vmem>>, vector<1x160xf32>
    %c0_5 = arith.constant 0 : index
    %c0_6 = arith.constant 0 : index
    %5 = vector.load %arg9[%c0_5, %c0_6] : memref<64x96xf32, #tpu.memory_space<vmem>>, vector<64x96xf32>
    %c0_7 = arith.constant 0 : index
    %c0_8 = arith.constant 0 : index
    %6 = vector.load %arg10[%c0_7, %c0_8] : memref<1x160xf32, #tpu.memory_space<vmem>>, vector<1x160xf32>
    %c0_9 = arith.constant 0 : index
    %c0_10 = arith.constant 0 : index
    %7 = vector.load %arg0[%c0_9, %c0_10] : memref<16x32xf32, #tpu.memory_space<vmem>>, vector<16x32xf32>
    %cst = arith.constant dense<0.000000e+00> : vector<16x160xf32>
    %8 = tpu.matmul %7, %3, %cst {dimension_numbers = #tpu.dot_dimension_numbers<[1], [0], [0], [1], [0, 0, 1, 1], [], []>} : vector<16x32xf32>, vector<32x160xf32>, vector<16x160xf32> -> vector<16x160xf32>
    %9 = vector.broadcast %4 : vector<1x160xf32> to vector<16x160xf32>
    %10 = arith.addf %8, %9 : vector<16x160xf32>
    %11 = vector.extract_strided_slice %10 {offsets = [0, 0], sizes = [16, 32], strides = [1, 1]} : vector<16x160xf32> to vector<16x32xf32>
    %12 = vector.extract_strided_slice %10 {offsets = [0, 32], sizes = [16, 32], strides = [1, 1]} : vector<16x160xf32> to vector<16x32xf32>
    %13 = vector.extract_strided_slice %10 {offsets = [0, 64], sizes = [16, 96], strides = [1, 1]} : vector<16x160xf32> to vector<16x96xf32>
    %cst_11 = arith.constant dense<0.000000e+00> : vector<16x32xf32>
    %14 = tpu.matmul %1, %11, %cst_11 {dimension_numbers = #tpu.dot_dimension_numbers<[1], [0], [0], [1], [0, 0, 1, 1], [], []>} : vector<16x16xf32>, vector<16x32xf32>, vector<16x32xf32> -> vector<16x32xf32>
    %15 = vector.extract_strided_slice %6 {offsets = [0, 0], sizes = [1, 32], strides = [1, 1]} : vector<1x160xf32> to vector<1x32xf32>
    %16 = vector.broadcast %15 : vector<1x32xf32> to vector<16x32xf32>
    %17 = arith.addf %14, %16 : vector<16x32xf32>
    %cst_12 = arith.constant dense<0.000000e+00> : vector<16x32xf32>
    %18 = tpu.matmul %2, %12, %cst_12 {dimension_numbers = #tpu.dot_dimension_numbers<[1], [0], [0], [1], [0, 0, 1, 1], [], []>} : vector<16x16xf32>, vector<16x32xf32>, vector<16x32xf32> -> vector<16x32xf32>
    %19 = vector.extract_strided_slice %6 {offsets = [0, 32], sizes = [1, 32], strides = [1, 1]} : vector<1x160xf32> to vector<1x32xf32>
    %20 = vector.broadcast %19 : vector<1x32xf32> to vector<16x32xf32>
    %21 = arith.addf %18, %20 : vector<16x32xf32>
    %22 = vector.extract_strided_slice %5 {offsets = [0, 0], sizes = [32, 96], strides = [1, 1]} : vector<64x96xf32> to vector<32x96xf32>
    %cst_13 = arith.constant dense<0.000000e+00> : vector<16x96xf32>
    %23 = tpu.matmul %17, %22, %cst_13 {dimension_numbers = #tpu.dot_dimension_numbers<[1], [0], [0], [1], [0, 0, 1, 1], [], []>} : vector<16x32xf32>, vector<32x96xf32>, vector<16x96xf32> -> vector<16x96xf32>
    %24 = vector.extract_strided_slice %5 {offsets = [32, 0], sizes = [32, 96], strides = [1, 1]} : vector<64x96xf32> to vector<32x96xf32>
    %cst_14 = arith.constant dense<0.000000e+00> : vector<16x96xf32>
    %25 = tpu.matmul %21, %24, %cst_14 {dimension_numbers = #tpu.dot_dimension_numbers<[1], [0], [0], [1], [0, 0, 1, 1], [], []>} : vector<16x32xf32>, vector<32x96xf32>, vector<16x96xf32> -> vector<16x96xf32>
    %26 = arith.addf %23, %25 : vector<16x96xf32>
    %27 = vector.extract_strided_slice %6 {offsets = [0, 64], sizes = [1, 96], strides = [1, 1]} : vector<1x160xf32> to vector<1x96xf32>
    %28 = vector.broadcast %27 : vector<1x96xf32> to vector<16x96xf32>
    %29 = arith.addf %26, %28 : vector<16x96xf32>
    %30 = vector.extract_strided_slice %29 {offsets = [0, 0], sizes = [16, 32], strides = [1, 1]} : vector<16x96xf32> to vector<16x32xf32>
    %31 = vector.extract_strided_slice %29 {offsets = [0, 32], sizes = [16, 32], strides = [1, 1]} : vector<16x96xf32> to vector<16x32xf32>
    %32 = vector.extract_strided_slice %29 {offsets = [0, 64], sizes = [16, 32], strides = [1, 1]} : vector<16x96xf32> to vector<16x32xf32>
    %33 = vector.extract_strided_slice %13 {offsets = [0, 0], sizes = [16, 32], strides = [1, 1]} : vector<16x96xf32> to vector<16x32xf32>
    %34 = vector.extract_strided_slice %13 {offsets = [0, 32], sizes = [16, 32], strides = [1, 1]} : vector<16x96xf32> to vector<16x32xf32>
    %35 = vector.extract_strided_slice %13 {offsets = [0, 64], sizes = [16, 32], strides = [1, 1]} : vector<16x96xf32> to vector<16x32xf32>
    %36 = arith.addf %30, %33 : vector<16x32xf32>
    %37 = arith.negf %36 : vector<16x32xf32>
    %38 = math.exp %37 : vector<16x32xf32>
    %cst_15 = arith.constant 1.000000e+00 : f32
    %39 = vector.broadcast %cst_15 : f32 to vector<16x32xf32>
    %40 = arith.addf %39, %38 : vector<16x32xf32>
    %41 = arith.divf %39, %40 : vector<16x32xf32>
    %42 = arith.addf %31, %34 : vector<16x32xf32>
    %43 = arith.negf %42 : vector<16x32xf32>
    %44 = math.exp %43 : vector<16x32xf32>
    %cst_16 = arith.constant 1.000000e+00 : f32
    %45 = vector.broadcast %cst_16 : f32 to vector<16x32xf32>
    %46 = arith.addf %45, %44 : vector<16x32xf32>
    %47 = arith.divf %45, %46 : vector<16x32xf32>
    %48 = arith.mulf %41, %35 : vector<16x32xf32>
    %49 = arith.addf %32, %48 : vector<16x32xf32>
    %50 = math.tanh %49 : vector<16x32xf32>
    %51 = arith.subf %7, %50 : vector<16x32xf32>
    %52 = arith.mulf %47, %51 : vector<16x32xf32>
    %53 = arith.addf %50, %52 : vector<16x32xf32>
    %c0_17 = arith.constant 0 : index
    %c0_18 = arith.constant 0 : index
    %54 = vector.load %arg2[%c0_17, %c0_18] : memref<16x16xf32, #tpu.memory_space<vmem>>, vector<16x16xf32>
    %cst_19 = arith.constant dense<0.000000e+00> : vector<16x32xf32>
    %55 = tpu.matmul %54, %53, %cst_19 {dimension_numbers = #tpu.dot_dimension_numbers<[1], [0], [0], [1], [0, 0, 1, 1], [], []>} : vector<16x16xf32>, vector<16x32xf32>, vector<16x32xf32> -> vector<16x32xf32>
    %c0_20 = arith.constant 0 : index
    %c0_21 = arith.constant 0 : index
    %56 = vector.load %arg6[%c0_20, %c0_21] : memref<2x16xf32, #tpu.memory_space<vmem>>, vector<2x16xf32>
    %cst_22 = arith.constant dense<0.000000e+00> : vector<2x32xf32>
    %57 = tpu.matmul %56, %55, %cst_22 {dimension_numbers = #tpu.dot_dimension_numbers<[1], [0], [0], [1], [0, 0, 1, 1], [], []>} : vector<2x16xf32>, vector<16x32xf32>, vector<2x32xf32> -> vector<2x32xf32>
    %c0_23 = arith.constant 0 : index
    %c0_24 = arith.constant 0 : index
    %58 = vector.load %arg4[%c0_23, %c0_24] : memref<16x1xf32, #tpu.memory_space<vmem>>, vector<16x1xf32>
    %c0_25 = arith.constant 0 : index
    %c0_26 = arith.constant 0 : index
    %c0_27 = arith.constant 0 : index
    %59 = vector.load %arg5[%c0_25, %c0_26, %c0_27] : memref<2x8x8xf32, #tpu.memory_space<vmem>>, vector<2x8x8xf32>
    %c0_28 = arith.constant 0 : index
    %c0_29 = arith.constant 0 : index
    %60 = vector.load %arg3[%c0_28, %c0_29] : memref<16x32xf32, #tpu.memory_space<vmem>>, vector<16x32xf32>
    %61 = arith.addf %55, %60 : vector<16x32xf32>
    %c0_30 = arith.constant 0 : index
    %c0_31 = arith.constant 0 : index
    %62 = vector.load %arg12[%c0_30, %c0_31] : memref<4x32xf32, #tpu.memory_space<vmem>>, vector<4x32xf32>
    %c0_32 = arith.constant 0 : index
    %c0_33 = arith.constant 0 : index
    %63 = vector.load %arg13[%c0_32, %c0_33] : memref<32x96xf32, #tpu.memory_space<vmem>>, vector<32x96xf32>
    %c0_34 = arith.constant 0 : index
    %c0_35 = arith.constant 0 : index
    %64 = vector.load %arg14[%c0_34, %c0_35] : memref<1x96xf32, #tpu.memory_space<vmem>>, vector<1x96xf32>
    %65 = vector.broadcast %58 : vector<16x1xf32> to vector<16x32xf32>
    %66 = arith.mulf %61, %65 : vector<16x32xf32>
    %67 = vector.extract_strided_slice %62 {offsets = [0, 0], sizes = [1, 32], strides = [1, 1]} : vector<4x32xf32> to vector<1x32xf32>
    %68 = vector.extract_strided_slice %62 {offsets = [1, 0], sizes = [1, 32], strides = [1, 1]} : vector<4x32xf32> to vector<1x32xf32>
    %cst_36 = arith.constant dense<0.000000e+00> : vector<16xf32>
    %69 = vector.multi_reduction <add>, %66, %cst_36 [1] : vector<16x32xf32> to vector<16xf32>
    %70 = vector.shape_cast %69 : vector<16xf32> to vector<16x1xf32>
    %cst_37 = arith.constant 3.200000e+01 : f32
    %71 = vector.broadcast %cst_37 : f32 to vector<16x1xf32>
    %72 = arith.divf %70, %71 : vector<16x1xf32>
    %73 = vector.broadcast %72 : vector<16x1xf32> to vector<16x32xf32>
    %74 = arith.subf %66, %73 : vector<16x32xf32>
    %75 = arith.mulf %74, %74 : vector<16x32xf32>
    %cst_38 = arith.constant dense<0.000000e+00> : vector<16xf32>
    %76 = vector.multi_reduction <add>, %75, %cst_38 [1] : vector<16x32xf32> to vector<16xf32>
    %77 = vector.shape_cast %76 : vector<16xf32> to vector<16x1xf32>
    %cst_39 = arith.constant 3.200000e+01 : f32
    %78 = vector.broadcast %cst_39 : f32 to vector<16x1xf32>
    %79 = arith.divf %77, %78 : vector<16x1xf32>
    %80 = vector.broadcast %72 : vector<16x1xf32> to vector<16x32xf32>
    %81 = arith.subf %66, %80 : vector<16x32xf32>
    %cst_40 = arith.constant 9.99999974E-6 : f32
    %82 = vector.broadcast %cst_40 : f32 to vector<16x1xf32>
    %83 = arith.addf %79, %82 : vector<16x1xf32>
    %84 = math.rsqrt %83 : vector<16x1xf32>
    %85 = vector.broadcast %84 : vector<16x1xf32> to vector<16x32xf32>
    %86 = arith.mulf %81, %85 : vector<16x32xf32>
    %87 = vector.broadcast %67 : vector<1x32xf32> to vector<16x32xf32>
    %88 = arith.mulf %86, %87 : vector<16x32xf32>
    %89 = vector.broadcast %68 : vector<1x32xf32> to vector<16x32xf32>
    %90 = arith.addf %88, %89 : vector<16x32xf32>
    %91 = vector.extract_strided_slice %63 {offsets = [0, 0], sizes = [32, 32], strides = [1, 1]} : vector<32x96xf32> to vector<32x32xf32>
    %cst_41 = arith.constant dense<0.000000e+00> : vector<16x32xf32>
    %92 = tpu.matmul %90, %91, %cst_41 {dimension_numbers = #tpu.dot_dimension_numbers<[1], [0], [0], [1], [0, 0, 1, 1], [], []>} : vector<16x32xf32>, vector<32x32xf32>, vector<16x32xf32> -> vector<16x32xf32>
    %93 = vector.extract_strided_slice %64 {offsets = [0, 0], sizes = [1, 32], strides = [1, 1]} : vector<1x96xf32> to vector<1x32xf32>
    %94 = vector.broadcast %93 : vector<1x32xf32> to vector<16x32xf32>
    %95 = arith.addf %92, %94 : vector<16x32xf32>
    %96 = vector.extract_strided_slice %63 {offsets = [0, 32], sizes = [32, 64], strides = [1, 1]} : vector<32x96xf32> to vector<32x64xf32>
    %cst_42 = arith.constant dense<0.000000e+00> : vector<16x64xf32>
    %97 = tpu.matmul %66, %96, %cst_42 {dimension_numbers = #tpu.dot_dimension_numbers<[1], [0], [0], [1], [0, 0, 1, 1], [], []>} : vector<16x32xf32>, vector<32x64xf32>, vector<16x64xf32> -> vector<16x64xf32>
    %98 = vector.extract_strided_slice %64 {offsets = [0, 32], sizes = [1, 64], strides = [1, 1]} : vector<1x96xf32> to vector<1x64xf32>
    %99 = vector.broadcast %98 : vector<1x64xf32> to vector<16x64xf32>
    %100 = arith.addf %97, %99 : vector<16x64xf32>
    %101 = vector.shape_cast %95 : vector<16x32xf32> to vector<2x8x32xf32>
    %102 = vector.extract_strided_slice %100 {offsets = [0, 0], sizes = [16, 32], strides = [1, 1]} : vector<16x64xf32> to vector<16x32xf32>
    %103 = vector.shape_cast %102 : vector<16x32xf32> to vector<2x8x32xf32>
    %104 = vector.extract_strided_slice %100 {offsets = [0, 32], sizes = [16, 32], strides = [1, 1]} : vector<16x64xf32> to vector<16x32xf32>
    %105 = vector.shape_cast %104 : vector<16x32xf32> to vector<2x8x32xf32>
    %106 = vector.extract_strided_slice %101 {offsets = [0, 0, 0], sizes = [2, 8, 16], strides = [1, 1, 1]} : vector<2x8x32xf32> to vector<2x8x16xf32>
    %107 = vector.extract_strided_slice %103 {offsets = [0, 0, 0], sizes = [2, 8, 16], strides = [1, 1, 1]} : vector<2x8x32xf32> to vector<2x8x16xf32>
    "tpu.trace_start"() <{level = 10 : i32, message = "bqd,bkd->bqk"}> : () -> ()
    %cst_43 = arith.constant dense<0.000000e+00> : vector<2x8x8xf32>
    %108 = tpu.matmul %106, %107, %cst_43 {dimension_numbers = #tpu.dot_dimension_numbers<[2], [2], [1], [1], [0, 0, 0, 1, 1, 1], [0], [0]>} : vector<2x8x16xf32>, vector<2x8x16xf32>, vector<2x8x8xf32> -> vector<2x8x8xf32>
    "tpu.trace_stop"() : () -> ()
    %cst_44 = arith.constant 2.500000e-01 : f32
    %109 = vector.broadcast %cst_44 : f32 to vector<2x8x8xf32>
    %110 = arith.mulf %108, %109 : vector<2x8x8xf32>
    %111 = arith.addf %110, %59 : vector<2x8x8xf32>
    %cst_45 = arith.constant dense<0xFF800000> : vector<2x8xf32>
    %112 = vector.multi_reduction <maximumf>, %111, %cst_45 [2] : vector<2x8x8xf32> to vector<2x8xf32>
    %113 = vector.shape_cast %112 : vector<2x8xf32> to vector<2x8x1xf32>
    %114 = vector.broadcast %113 : vector<2x8x1xf32> to vector<2x8x8xf32>
    %115 = arith.subf %111, %114 : vector<2x8x8xf32>
    %116 = math.exp %115 : vector<2x8x8xf32>
    %cst_46 = arith.constant dense<0.000000e+00> : vector<2x8xf32>
    %117 = vector.multi_reduction <add>, %116, %cst_46 [2] : vector<2x8x8xf32> to vector<2x8xf32>
    %118 = vector.shape_cast %117 : vector<2x8xf32> to vector<2x8x1xf32>
    %119 = tpu.reciprocal %118 {approx = true} : vector<2x8x1xf32> -> vector<2x8x1xf32>
    %120 = vector.broadcast %119 : vector<2x8x1xf32> to vector<2x8x8xf32>
    %121 = arith.mulf %116, %120 : vector<2x8x8xf32>
    %122 = vector.extract_strided_slice %105 {offsets = [0, 0, 0], sizes = [2, 8, 16], strides = [1, 1, 1]} : vector<2x8x32xf32> to vector<2x8x16xf32>
    "tpu.trace_start"() <{level = 10 : i32, message = "bqk,bkd->bqd"}> : () -> ()
    %cst_47 = arith.constant dense<0.000000e+00> : vector<2x8x16xf32>
    %123 = tpu.matmul %121, %122, %cst_47 {dimension_numbers = #tpu.dot_dimension_numbers<[2], [1], [1], [2], [0, 0, 0, 1, 1, 2], [0], [0]>} : vector<2x8x8xf32>, vector<2x8x16xf32>, vector<2x8x16xf32> -> vector<2x8x16xf32>
    "tpu.trace_stop"() : () -> ()
    %124 = vector.extract_strided_slice %101 {offsets = [0, 0, 16], sizes = [2, 8, 16], strides = [1, 1, 1]} : vector<2x8x32xf32> to vector<2x8x16xf32>
    %125 = vector.extract_strided_slice %103 {offsets = [0, 0, 16], sizes = [2, 8, 16], strides = [1, 1, 1]} : vector<2x8x32xf32> to vector<2x8x16xf32>
    "tpu.trace_start"() <{level = 10 : i32, message = "bqd,bkd->bqk"}> : () -> ()
    %cst_48 = arith.constant dense<0.000000e+00> : vector<2x8x8xf32>
    %126 = tpu.matmul %124, %125, %cst_48 {dimension_numbers = #tpu.dot_dimension_numbers<[2], [2], [1], [1], [0, 0, 0, 1, 1, 1], [0], [0]>} : vector<2x8x16xf32>, vector<2x8x16xf32>, vector<2x8x8xf32> -> vector<2x8x8xf32>
    "tpu.trace_stop"() : () -> ()
    %cst_49 = arith.constant 2.500000e-01 : f32
    %127 = vector.broadcast %cst_49 : f32 to vector<2x8x8xf32>
    %128 = arith.mulf %126, %127 : vector<2x8x8xf32>
    %129 = arith.addf %128, %59 : vector<2x8x8xf32>
    %cst_50 = arith.constant dense<0xFF800000> : vector<2x8xf32>
    %130 = vector.multi_reduction <maximumf>, %129, %cst_50 [2] : vector<2x8x8xf32> to vector<2x8xf32>
    %131 = vector.shape_cast %130 : vector<2x8xf32> to vector<2x8x1xf32>
    %132 = vector.broadcast %131 : vector<2x8x1xf32> to vector<2x8x8xf32>
    %133 = arith.subf %129, %132 : vector<2x8x8xf32>
    %134 = math.exp %133 : vector<2x8x8xf32>
    %cst_51 = arith.constant dense<0.000000e+00> : vector<2x8xf32>
    %135 = vector.multi_reduction <add>, %134, %cst_51 [2] : vector<2x8x8xf32> to vector<2x8xf32>
    %136 = vector.shape_cast %135 : vector<2x8xf32> to vector<2x8x1xf32>
    %137 = tpu.reciprocal %136 {approx = true} : vector<2x8x1xf32> -> vector<2x8x1xf32>
    %138 = vector.broadcast %137 : vector<2x8x1xf32> to vector<2x8x8xf32>
    %139 = arith.mulf %134, %138 : vector<2x8x8xf32>
    %140 = vector.extract_strided_slice %105 {offsets = [0, 0, 16], sizes = [2, 8, 16], strides = [1, 1, 1]} : vector<2x8x32xf32> to vector<2x8x16xf32>
    "tpu.trace_start"() <{level = 10 : i32, message = "bqk,bkd->bqd"}> : () -> ()
    %cst_52 = arith.constant dense<0.000000e+00> : vector<2x8x16xf32>
    %141 = tpu.matmul %139, %140, %cst_52 {dimension_numbers = #tpu.dot_dimension_numbers<[2], [1], [1], [2], [0, 0, 0, 1, 1, 2], [0], [0]>} : vector<2x8x8xf32>, vector<2x8x16xf32>, vector<2x8x16xf32> -> vector<2x8x16xf32>
    "tpu.trace_stop"() : () -> ()
    %142 = tpu.concatenate %123, %141 in 2 : vector<2x8x16xf32>, vector<2x8x16xf32> -> vector<2x8x32xf32>
    %143 = vector.shape_cast %142 : vector<2x8x32xf32> to vector<16x32xf32>
    %c0_53 = arith.constant 0 : index
    %c0_54 = arith.constant 0 : index
    %144 = vector.load %arg15[%c0_53, %c0_54] : memref<32x32xf32, #tpu.memory_space<vmem>>, vector<32x32xf32>
    %cst_55 = arith.constant dense<0.000000e+00> : vector<16x32xf32>
    %145 = tpu.matmul %143, %144, %cst_55 {dimension_numbers = #tpu.dot_dimension_numbers<[1], [0], [0], [1], [0, 0, 1, 1], [], []>} : vector<16x32xf32>, vector<32x32xf32>, vector<16x32xf32> -> vector<16x32xf32>
    %c0_56 = arith.constant 0 : index
    %c0_57 = arith.constant 0 : index
    %146 = vector.load %arg16[%c0_56, %c0_57] : memref<1x32xf32, #tpu.memory_space<vmem>>, vector<1x32xf32>
    %147 = vector.broadcast %146 : vector<1x32xf32> to vector<16x32xf32>
    %148 = arith.addf %145, %147 : vector<16x32xf32>
    %149 = arith.addf %90, %148 : vector<16x32xf32>
    %150 = vector.extract_strided_slice %62 {offsets = [2, 0], sizes = [1, 32], strides = [1, 1]} : vector<4x32xf32> to vector<1x32xf32>
    %151 = vector.extract_strided_slice %62 {offsets = [3, 0], sizes = [1, 32], strides = [1, 1]} : vector<4x32xf32> to vector<1x32xf32>
    %cst_58 = arith.constant dense<0.000000e+00> : vector<16xf32>
    %152 = vector.multi_reduction <add>, %149, %cst_58 [1] : vector<16x32xf32> to vector<16xf32>
    %153 = vector.shape_cast %152 : vector<16xf32> to vector<16x1xf32>
    %cst_59 = arith.constant 3.200000e+01 : f32
    %154 = vector.broadcast %cst_59 : f32 to vector<16x1xf32>
    %155 = arith.divf %153, %154 : vector<16x1xf32>
    %156 = vector.broadcast %155 : vector<16x1xf32> to vector<16x32xf32>
    %157 = arith.subf %149, %156 : vector<16x32xf32>
    %158 = arith.mulf %157, %157 : vector<16x32xf32>
    %cst_60 = arith.constant dense<0.000000e+00> : vector<16xf32>
    %159 = vector.multi_reduction <add>, %158, %cst_60 [1] : vector<16x32xf32> to vector<16xf32>
    %160 = vector.shape_cast %159 : vector<16xf32> to vector<16x1xf32>
    %cst_61 = arith.constant 3.200000e+01 : f32
    %161 = vector.broadcast %cst_61 : f32 to vector<16x1xf32>
    %162 = arith.divf %160, %161 : vector<16x1xf32>
    %163 = vector.broadcast %155 : vector<16x1xf32> to vector<16x32xf32>
    %164 = arith.subf %149, %163 : vector<16x32xf32>
    %cst_62 = arith.constant 9.99999974E-6 : f32
    %165 = vector.broadcast %cst_62 : f32 to vector<16x1xf32>
    %166 = arith.addf %162, %165 : vector<16x1xf32>
    %167 = math.rsqrt %166 : vector<16x1xf32>
    %168 = vector.broadcast %167 : vector<16x1xf32> to vector<16x32xf32>
    %169 = arith.mulf %164, %168 : vector<16x32xf32>
    %170 = vector.broadcast %150 : vector<1x32xf32> to vector<16x32xf32>
    %171 = arith.mulf %169, %170 : vector<16x32xf32>
    %172 = vector.broadcast %151 : vector<1x32xf32> to vector<16x32xf32>
    %173 = arith.addf %171, %172 : vector<16x32xf32>
    %c0_63 = arith.constant 0 : index
    %c0_64 = arith.constant 0 : index
    %174 = vector.load %arg17[%c0_63, %c0_64] : memref<64x32xf32, #tpu.memory_space<vmem>>, vector<64x32xf32>
    %c0_65 = arith.constant 0 : index
    %c0_66 = arith.constant 0 : index
    %175 = vector.load %arg18[%c0_65, %c0_66] : memref<2x32xf32, #tpu.memory_space<vmem>>, vector<2x32xf32>
    %176 = vector.extract_strided_slice %174 {offsets = [0, 0], sizes = [32, 32], strides = [1, 1]} : vector<64x32xf32> to vector<32x32xf32>
    %cst_67 = arith.constant dense<0.000000e+00> : vector<16x32xf32>
    %177 = tpu.matmul %173, %176, %cst_67 {dimension_numbers = #tpu.dot_dimension_numbers<[1], [0], [0], [1], [0, 0, 1, 1], [], []>} : vector<16x32xf32>, vector<32x32xf32>, vector<16x32xf32> -> vector<16x32xf32>
    %178 = vector.extract_strided_slice %175 {offsets = [0, 0], sizes = [1, 32], strides = [1, 1]} : vector<2x32xf32> to vector<1x32xf32>
    %179 = vector.broadcast %178 : vector<1x32xf32> to vector<16x32xf32>
    %180 = arith.addf %177, %179 : vector<16x32xf32>
    %cst_68 = arith.constant 0.000000e+00 : f32
    %181 = vector.broadcast %cst_68 : f32 to vector<16x32xf32>
    %182 = arith.maximumf %180, %181 : vector<16x32xf32>
    %183 = vector.extract_strided_slice %174 {offsets = [32, 0], sizes = [32, 32], strides = [1, 1]} : vector<64x32xf32> to vector<32x32xf32>
    %cst_69 = arith.constant dense<0.000000e+00> : vector<16x32xf32>
    %184 = tpu.matmul %182, %183, %cst_69 {dimension_numbers = #tpu.dot_dimension_numbers<[1], [0], [0], [1], [0, 0, 1, 1], [], []>} : vector<16x32xf32>, vector<32x32xf32>, vector<16x32xf32> -> vector<16x32xf32>
    %185 = vector.extract_strided_slice %175 {offsets = [1, 0], sizes = [1, 32], strides = [1, 1]} : vector<2x32xf32> to vector<1x32xf32>
    %186 = vector.broadcast %185 : vector<1x32xf32> to vector<16x32xf32>
    %187 = arith.addf %184, %186 : vector<16x32xf32>
    %188 = arith.addf %173, %187 : vector<16x32xf32>
    %189 = vector.broadcast %58 : vector<16x1xf32> to vector<16x32xf32>
    %190 = arith.mulf %188, %189 : vector<16x32xf32>
    %c0_70 = arith.constant 0 : index
    %c0_71 = arith.constant 0 : index
    %191 = vector.load %arg11[%c0_70, %c0_71] : memref<2x32xf32, #tpu.memory_space<vmem>>, vector<2x32xf32>
    %192 = vector.extract_strided_slice %191 {offsets = [0, 0], sizes = [1, 32], strides = [1, 1]} : vector<2x32xf32> to vector<1x32xf32>
    %193 = vector.extract_strided_slice %191 {offsets = [1, 0], sizes = [1, 32], strides = [1, 1]} : vector<2x32xf32> to vector<1x32xf32>
    %cst_72 = arith.constant dense<0.000000e+00> : vector<16xf32>
    %194 = vector.multi_reduction <add>, %190, %cst_72 [1] : vector<16x32xf32> to vector<16xf32>
    %195 = vector.shape_cast %194 : vector<16xf32> to vector<16x1xf32>
    %cst_73 = arith.constant 3.200000e+01 : f32
    %196 = vector.broadcast %cst_73 : f32 to vector<16x1xf32>
    %197 = arith.divf %195, %196 : vector<16x1xf32>
    %198 = vector.broadcast %197 : vector<16x1xf32> to vector<16x32xf32>
    %199 = arith.subf %190, %198 : vector<16x32xf32>
    %200 = arith.mulf %199, %199 : vector<16x32xf32>
    %cst_74 = arith.constant dense<0.000000e+00> : vector<16xf32>
    %201 = vector.multi_reduction <add>, %200, %cst_74 [1] : vector<16x32xf32> to vector<16xf32>
    %202 = vector.shape_cast %201 : vector<16xf32> to vector<16x1xf32>
    %cst_75 = arith.constant 3.200000e+01 : f32
    %203 = vector.broadcast %cst_75 : f32 to vector<16x1xf32>
    %204 = arith.divf %202, %203 : vector<16x1xf32>
    %205 = vector.broadcast %197 : vector<16x1xf32> to vector<16x32xf32>
    %206 = arith.subf %190, %205 : vector<16x32xf32>
    %cst_76 = arith.constant 9.99999974E-6 : f32
    %207 = vector.broadcast %cst_76 : f32 to vector<16x1xf32>
    %208 = arith.addf %204, %207 : vector<16x1xf32>
    %209 = math.rsqrt %208 : vector<16x1xf32>
    %210 = vector.broadcast %209 : vector<16x1xf32> to vector<16x32xf32>
    %211 = arith.mulf %206, %210 : vector<16x32xf32>
    %212 = vector.broadcast %192 : vector<1x32xf32> to vector<16x32xf32>
    %213 = arith.mulf %211, %212 : vector<16x32xf32>
    %214 = vector.broadcast %193 : vector<1x32xf32> to vector<16x32xf32>
    %215 = arith.addf %213, %214 : vector<16x32xf32>
    %cst_77 = arith.constant dense<0.000000e+00> : vector<2x32xf32>
    %216 = tpu.matmul %56, %215, %cst_77 {dimension_numbers = #tpu.dot_dimension_numbers<[1], [0], [0], [1], [0, 0, 1, 1], [], []>} : vector<2x16xf32>, vector<16x32xf32>, vector<2x32xf32> -> vector<2x32xf32>
    %cst_78 = arith.constant 4.000000e-01 : f32
    %217 = vector.broadcast %cst_78 : f32 to vector<2x32xf32>
    %218 = arith.mulf %217, %216 : vector<2x32xf32>
    %cst_79 = arith.constant 6.000000e-01 : f32
    %219 = vector.broadcast %cst_79 : f32 to vector<2x32xf32>
    %220 = arith.mulf %219, %57 : vector<2x32xf32>
    %221 = arith.addf %218, %220 : vector<2x32xf32>
    %c0_80 = arith.constant 0 : index
    %c0_81 = arith.constant 0 : index
    %222 = vector.load %arg19[%c0_80, %c0_81] : memref<2x32xf32, #tpu.memory_space<vmem>>, vector<2x32xf32>
    tpu.vector_store %arg19[%c0_80, %c0_81], %221 {strides = array<i32>} : memref<2x32xf32, #tpu.memory_space<vmem>>, vector<2x32xf32>,
    return
  }
}

</mosaic_0001>

<bundles_post_ra>
// kernel: _device_forward.1
= control target key start
LH: loop header
LB: loop body
LE: loop exit
PB: predicated region body
PF: predicated region fallthrough
CT: control target
= control target key end

     0   :  { %s3082_s0 = inlined_call_operand.vmem [shape: f32[16,32], index: 0, kind: input, shape index: {}]   ;;  %s3083_s1 = inlined_call_operand.vmem [shape: f32[16,32], index: 1, kind: input, shape index: {}]   ;;  %s3084_s2 = inlined_call_operand.vmem [shape: f32[16,16], index: 2, kind: input, shape index: {}]   ;;  %s3085_s3 = inlined_call_operand.vmem [shape: f32[16,32], index: 3, kind: input, shape index: {}]   ;;  %s3086_s4 = inlined_call_operand.vmem [shape: f32[16,1], index: 4, kind: input, shape index: {}]   ;;  %s3087_s5 = inlined_call_operand.vmem [shape: f32[2,8,8], index: 5, kind: input, shape index: {}]   ;;  %s3088_s6 = inlined_call_operand.vmem [shape: f32[2,16], index: 6, kind: input, shape index: {}]   ;;  %s3089_s7 = inlined_call_operand.vmem [shape: f32[32,160], index: 7, kind: input, shape index: {}]   ;;  %s3090_s8 = inlined_call_operand.vmem [shape: f32[1,160], index: 8, kind: input, shape index: {}]   ;;  %s3091_s9 = inlined_call_operand.vmem [shape: f32[64,96], index: 9, kind: input, shape index: {}]   ;;  %s3092_s10 = inlined_call_operand.vmem [shape: f32[1,160], index: 10, kind: input, shape index: {}]   ;;  %s3093_s11 = inlined_call_operand.vmem [shape: f32[2,32], index: 11, kind: input, shape index: {}]   ;;  %s3094_s12 = inlined_call_operand.vmem [shape: f32[4,32], index: 12, kind: input, shape index: {}]   ;;  %s3095_s13 = inlined_call_operand.vmem [shape: f32[32,96], index: 13, kind: input, shape index: {}]   ;;  %s3096_s14 = inlined_call_operand.vmem [shape: f32[1,96], index: 14, kind: input, shape index: {}]   ;;  %s3097_s15 = inlined_call_operand.vmem [shape: f32[32,32], index: 15, kind: input, shape index: {}]   ;;  %s3098_s16 = inlined_call_operand.vmem [shape: f32[1,32], index: 16, kind: input, shape index: {}]   ;;  %s3099_s17 = inlined_call_operand.vmem [shape: f32[64,32], index: 17, kind: input, shape index: {}]   ;;  %s3100_s18 = inlined_call_operand.vmem [shape: f32[2,32], index: 18, kind: input, shape index: {}]   ;;  %s3101_s19 = inlined_call_operand.hbm [shape: f32[2,32], index: 19, kind: output, shape index: {}]  }
   0x1   :  { %3106 = sst [smem:[#allocation5_spill]] %s3082_s0 }
   0x2   :  { %3107 = sst [smem:[#allocation6_spill]] %s3083_s1 }
   0x3   :  { %3108 = sst [smem:[#allocation7_spill]] %s3084_s2 }
   0x4   :  { %3109 = sst [smem:[#allocation8_spill]] %s3085_s3 }
   0x5   :  { %v66_v0 = vld [vmem:[%s3089_s7 + $0x8] sm:$0xff]  ;;  %v68_v1 = vld [vmem:[%s3089_s7 + $0x18] sm:$0xff]  ;;  %v65_v2 = vld [vmem:[%s3089_s7] sm:$0xff]  ;;  %v86_v3 = vlaneseq  ;;  %v2587_v8 = vmov 0.0   ;;  %s3110_s21 = sld [smem:[#allocation6_spill]]  ;;  %s2588_s2 = smov 112  }
   0x6   :  { %v2406_v4 = vpack.c.bf16 %v68_v1, %v66_v0  ;;  %v67_v5 = vld [vmem:[%s3089_s7 + $0x10] sm:$0xff]  ;;  %v70_v6 = vld [vmem:[%s3089_s7 + $0x28] sm:$0xff]  ;;  %v72_v7 = vld [vmem:[%s3089_s7 + $0x38] sm:$0xff]  ;;  %167 = vmatprep.mubr.f32.mxu0 %v2587_v8 }
   0x7   :  { %v2408_v9 = vpack.c.bf16 %v67_v5, %v65_v2  ;;  %v2410_v10 = vpack.c.bf16 %v72_v7, %v70_v6  ;;  %v69_v11 = vld [vmem:[%s3089_s7 + $0x20] sm:$0xff]  ;;  %v71_v12 = vld [vmem:[%s3089_s7 + $0x30] sm:$0xff]  ;;  %v2723_v13 = vshrl.u32 %v86_v3, 7 }
   0x8   :  { %2407 = vmatprep.subr.bf16.mxu0 %v2406_v4  ;;  %v82_v15 = vld [vmem:[%s3092_s10] sm:$0x3]  ;;  %v2412_v16 = vpack.c.bf16 %v71_v12, %v69_v11 }
   0x9   :  { %2409 = vmatpush1.bf16.msra.mxu0 %v2408_v9  ;;  %v2733_v17 = vsub.s32 0, %v2723_v13 }
   0xb   :  { %v64_v14 = vld [vmem:[%s3110_s21 + $0x8] sm:$0xff] }
   0xc   :  { %270 = vrot.lane.b32.xlu1 %v64_v14, %s2588_s2 }
   0xd   :  { %24 = vsyncpa [#allocation3], 0  ;;  %2411 = vmatprep.subr.bf16.mxu0 %v2410_v10  ;;  %v2736_v18 = vrot.slane %v82_v15, %v2733_v17  ;;  %s3111_s24 = sld [smem:[#allocation5_spill]]  ;;  %vm96_vm0 = vcmask 261120   ;;  %s2589_s10 = smov 96   ;;  %v2756_v21 = vsub.s32 1, %v2723_v13 }
   0xe   :  { %2413 = vmatpush1.bf16.msra.mxu0 %v2412_v16  ;;  %s2590_s26 = smov 64   ;;  %v63_v23 = vld [vmem:[%s3110_s21] sm:$0xff]  ;;  %vm186_vm1 = vcmask 130048   ;;  %v79_v35 = vld [vmem:[%s3091_s9 + $0x28] sm:$0xff]  ;;  %v80_v43 = vld [vmem:[%s3091_s9 + $0x30] sm:$0xff]  ;;  %vm532_vm2 = vcmask 523264  }
   0xf   :  { %v527_v22 = vrot.slane %v82_v15, %v2756_v21  ;;  %v2766_v24 = vld [vmem:[%s3090_s8] sm:$0x3]  ;;  %2258 = vmatprep.mubr.msk.f32.mxu1 %vm186_vm1, %v63_v23  ;;  %v81_v44 = vld [vmem:[%s3091_s9 + $0x38] sm:$0xff]  ;;  %v75_v47 = vld [vmem:[%s3091_s9 + $0x8] sm:$0xff]  ;;  %s3112_s21 = sld [smem:[#allocation7_spill]]  ;;  %s3113_s27 = sld [smem:[#allocation8_spill]] }
  0x10   :  { %280 = vrot.lane.b32.xlu1 %v2736_v18, %s2589_s10  ;;  %v89_v26 = vrot.slane %v2766_v24, %v2733_v17  ;;  %v78_v34 = vld [vmem:[%s3091_s9 + $0x20] sm:$0xff]  ;;  %v2426_v45 = vpack.c.bf16 %v81_v44, %v80_v43  ;;  %v76_v52 = vld [vmem:[%s3091_s9 + $0x10] sm:$0xff]  ;;  %v77_v53 = vld [vmem:[%s3091_s9 + $0x18] sm:$0xff]  ;;  %v93_v16 = vrot.slane %v2766_v24, %v2756_v21  ;;  %vm2594_vm3 = vmmov 0   ;;  %s2596_s8 = smov 16   ;;  %s2597_s3 = smov [#allocation2]  }
  0x11   :  { %v2422_v36 = vpack.c.bf16 %v79_v35, %v78_v34  ;;  %v74_v46 = vld [vmem:[%s3091_s9] sm:$0xff]  ;;  %v2434_v58 = vpack.c.bf16 %v77_v53, %v76_v52  ;;  %s2591_s9 = smov 32   ;;  %v2593_v53 = vmov 0.0|0.0   ;;  %vm1174_vm4 = vcmask 64512  }
  0x12   :  { %v2430_v48 = vpack.c.bf16 %v75_v47, %v74_v46  ;;  %v767_v47 = vld [vmem:[%s3086_s4 + $0x8] sm:$0xff]  ;;  %vm2122_vm5 = vcmask 254976  }
  0x13   :  { %v2741_v19 = vld [vmem:[%s3111_s24] sm:$0xff]  ;;  %v2751_v20 = vld [vmem:[%s3111_s24 + $0x8] sm:$0xff]  ;;  %2423 = vmatprep.subr.bf16.mxu0 %v2422_v36 }
  0x14   :  { %2138 = vmatmul.mubr.msk.f32.vlgmr.msra.gmra.mrb[0].mxu0 %vm96_vm0, %v2741_v19  ;;  %530 = vrot.lane.b32.xlu1 %v527_v22, %s2590_s26 }
  0x15   :  { %173 = vmatprep.mubr.f32.mxu0 %v2587_v8  ;;  %2425 = vmatpush3.bf16.msra.mxu0 %v2422_v36  ;;  %v602_v52 = vld [vmem:[%s3112_s21 + $0x8] sm:$0xff] }
  0x16   :  { %2427 = vmatprep.subr.bf16.mxu0 %v2426_v45 }
  0x18   :  { %2139 = vmatmul.mubr.msk.f32.gmra.mrb[2].mxu0 %vm96_vm0, %v2751_v20 }
  0x19   :  { %2429 = vmatpush3.bf16.msra.mxu0 %v2426_v45  ;;  %v2592_v45 = vmov 0  }
  0x1a   :  { %2431 = vmatprep.subr.bf16.mxu0 %v2430_v48  ;;  %2512 = vset.pattern.permute.xlu0 %v2592_v45 }
  0x1b   :  { %2511 = vset.pattern.permute.xlu1 %v2592_v45 }
  0x7e   :  { %v271_v42 = vpop.permute.xlu1 %270 }
  0x82   :  { %v281_v54 = vpop.permute.xlu1 %280 }
  0x86   :  { %v531_v61 = vpop.permute.xlu1 %530 }
  0xe7   :  { %v169_v25 = vpop.f32.mrb[0].mxu0 }
  0xe8   :  { %v2771_v27 = vpop.f32.mrb[1].mxu0  ;;  %v170_v29 = vadd.f32 %v169_v25, %v89_v26 }
  0xeb   :  { %v175_v28 = vpop.f32.mrb[2].mxu0 }
  0xec   :  { %v176_v30 = vadd.f32 %v175_v28, %v89_v26  ;;  %v2773_v31 = vpop.f32.mrb[3].mxu0 }
  0xee   :  { %539 = vrot.lane.b32.xlu1 %v176_v30, %s2590_s26  ;;  %v2501_v32 = vpack.i.bf16 %v176_v30, %v170_v29  ;;  %v2414_v33 = vpack.c.bf16 %v176_v30, %v170_v29 }
  0xf0   :  { %2502 = vrot.lane.b32.xlu0 %v2501_v32, %s2589_s10  ;;  %2415 = vmatprep.subr.bf16.mxu1 %v2414_v33 }
  0xf1   :  { %2417 = vmatpush3.bf16.msra.mxu1 %v2414_v33 }
  0xf4   :  { %268 = vrot.lane.b32.xlu0 %v63_v23, %s2588_s2  ;;  %2259 = vmatmul.mubr.msk.f32.vlgmr.msra.gmra.mrb[0].mxu1 %vm186_vm1, %v64_v14  ;;  %v172_v23 = vadd.f32 %v2771_v27, %v93_v16 }
  0xf8   :  { %528 = vrot.lane.b32.xlu0 %v2736_v18, %s2590_s26 }
  0xfc   :  { %537 = vrot.lane.b32.xlu0 %v170_v29, %s2590_s26 }
 0x160   :  { %v540_v3 = vpop.permute.xlu1 %539 }
 0x162   :  { %v2503_v37 = vpop.permute.xlu0 %2502 }
 0x163   :  { %v2505_v38 = vunpack.i.h.bf16 %v2503_v37  ;;  %v2504_v39 = vunpack.i.l.bf16 %v2503_v37 }
 0x165   :  { %v2418_v40 = vpack.c.bf16 %v2505_v38, %v2504_v39 }
 0x166   :  { %v269_v41 = vpop.permute.xlu0 %268 }
 0x167   :  { %2419 = vmatprep.subr.bf16.mxu1 %v2418_v40  ;;  %2265 = vmatprep.mubr.msk.f32.mxu1 %vm186_vm1, %v269_v41  ;;  %v601_v41 = vld [vmem:[%s3112_s21] sm:$0xff] }
 0x168   :  { %2421 = vmatpush3.bf16.msra.mxu1 %v2418_v40 }
 0x16a   :  { %v529_v62 = vpop.permute.xlu0 %528 }
 0x16b   :  { %2266 = vmatmul.mubr.msk.f32.vlgmr.msra.gmra.mrb[2].mxu1 %vm186_vm1, %v271_v42  ;;  %v533_v63 = vsel %vm532_vm2, %v529_v62, %v531_v61 }
 0x16c   :  { %2294 = vmatprep.mubr.msk.f32.mxu1 %vm186_vm1, %v601_v41 }
 0x16e   :  { %v538_v5 = vpop.permute.xlu0 %537 }
 0x1c7   :  { %v2260_v49 = vpop.f32.mrb[0].mxu1 }
 0x1c8   :  { %v259_v50 = vpop.f32.mrb[1].mxu1  ;;  %v265_v60 = vadd.f32 %v2260_v49, %v2736_v18 }
 0x1c9   :  { %v260_v59 = vadd.f32 %v259_v50, %v2736_v18  ;;  %v178_v18 = vadd.f32 %v2773_v31, %v93_v16  ;;  %v776_v16 = vld [vmem:[%s3095_s13 + $0x8] sm:$0xff] }
 0x23e   :  { %v2267_v51 = vpop.f32.mrb[2].mxu1 }
 0x23f   :  { %v353_v55 = vpop.f32.mrb[3].mxu1  ;;  %v359_v57 = vadd.f32 %v2267_v51, %v281_v54 }
 0x240   :  { %v354_v56 = vadd.f32 %v353_v55, %v281_v54  ;;  %v771_v54 = vld [vmem:[%s3113_s27 + $0x8] sm:$0xff]  ;;  %v770_v55 = vld [vmem:[%s3113_s27] sm:$0xff] }
 0x242   :  { %2276 = vmatprep.mubr.msk.f32.mxu0 %vm96_vm0, %v354_v56 }
 0x243   :  { %2277 = vmatmul.mubr.msk.f32.vlgmr.msra.gmra.mrb[4].mxu0 %vm96_vm0, %v359_v57 }
 0x244   :  { %2433 = vmatpush3.bf16.msra.mxu0 %v2430_v48  ;;  %2287 = vmatprep.mubr.msk.f32.mxu0 %vm96_vm0, %v260_v59 }
 0x245   :  { %2435 = vmatprep.subr.bf16.mxu0 %v2434_v58 }
 0x248   :  { %2437 = vmatpush3.bf16.msra.mxu0 %v2434_v58 }
 0x24b   :  { %2288 = vmatmul.mubr.msk.f32.vlgmr.msra.gmra.mrb[4].mxu0 %vm96_vm0, %v265_v60 }
 0x31e   :  { %v2289_v0 = vpop.f32.mrb[4].mxu0 }
 0x31f   :  { %v536_v1 = vadd.f32 %v2289_v0, %v533_v63  ;;  %v515_v2 = vpop.f32.mrb[5].mxu0 }
 0x320   :  { %v535_v4 = vadd.f32 %v533_v63, %v515_v2 }
 0x321   :  { %v544_v6 = vadd.f32 %v540_v3, %v536_v1 }
 0x322   :  { %v543_v7 = vadd.f32 %v538_v5, %v535_v4 }
 0x323   :  { %v2149_v9 = vmul.f32 -1.442695, %v544_v6 }
 0x324   :  { %v2148_v10 = vmul.f32 -1.442695, %v543_v7 }
 0x325   :  { %2523 = vpow2.f32 %v2149_v9 }
 0x326   :  { %2525 = vpow2.f32 %v2148_v10 }
 0x32f   :  { %v2524_v11 = vpop.eup %2523 }
 0x330   :  { %v2526_v12 = vpop.eup %2525  ;;  %v552_v14 = vadd.f32 1.0, %v2524_v11 }
 0x331   :  { %v551_v15 = vadd.f32 1.0, %v2526_v12 }
 0x332   :  { %2527 = vrcp.f32 %v552_v14 }
 0x333   :  { %2529 = vrcp.f32 %v551_v15  ;;  %v775_v15 = vld [vmem:[%s3095_s13] sm:$0xff] }
 0x33c   :  { %v2528_v22 = vpop.eup %2527 }
 0x33d   :  { %v2530_v25 = vpop.eup %2529  ;;  %v558_v26 = vmul.f32 %v2528_v22, %v178_v18  ;;  %v2513_v18 = vpack.i.bf16 %v776_v16, %v775_v15 }
 0x33e   :  { %v557_v28 = vmul.f32 %v2530_v25, %v172_v23  ;;  %v778_v23 = vld [vmem:[%s3095_s13 + $0x18] sm:$0xff] }
 0x33f   :  { %563 = vrot.lane.b32.xlu1 %v558_v26, %s2590_s26  ;;  %v2445_v26 = vpack.c.bf16 %v776_v16, %v775_v15 }
 0x340   :  { %561 = vrot.lane.b32.xlu0 %v557_v28, %s2590_s26  ;;  %v2880_v28 = vld [vmem:[%s3088_s6] sm:$0x3] }
 0x3b1   :  { %v564_v29 = vpop.permute.xlu1 %563 }
 0x3b2   :  { %v568_v30 = vadd.f32 %v564_v29, %v536_v1  ;;  %v562_v32 = vpop.permute.xlu0 %561 }
 0x3b3   :  { %v567_v33 = vadd.f32 %v562_v32, %v535_v4 }
 0x3b4   :  { %2531 = vtanh.f32 %v568_v30  ;;  %v2153_v30 = vld [vmem:[%s3096_s14] ss:$0 sm:$0xff] }
 0x3b5   :  { %2533 = vtanh.f32 %v567_v33 }
 0x3be   :  { %v2532_v34 = vpop.eup %2531 }
 0x3bf   :  { %v2534_v24 = vpop.eup %2533  ;;  %575 = vrot.lane.b32.xlu1 %v2532_v34, %s2590_s26 }
 0x3c0   :  { %573 = vrot.lane.b32.xlu0 %v2534_v24, %s2590_s26 }
 0x431   :  { %v576_v27 = vpop.permute.xlu1 %575 }
 0x432   :  { %v580_v31 = vsub.f32 %v2751_v20, %v576_v27  ;;  %v574_v35 = vpop.permute.xlu0 %573 }
 0x433   :  { %v579_v36 = vsub.f32 %v2741_v19, %v574_v35  ;;  %v766_v19 = vld [vmem:[%s3086_s4] sm:$0xff] }
 0x434   :  { %585 = vrot.lane.b32.xlu1 %v580_v31, %s2591_s9 }
 0x435   :  { %583 = vrot.lane.b32.xlu0 %v579_v36, %s2591_s9 }
 0x4a6   :  { %v586_v37 = vpop.permute.xlu1 %585 }
 0x4a7   :  { %v590_v38 = vmul.f32 %v2528_v22, %v586_v37  ;;  %v584_v39 = vpop.permute.xlu0 %583  ;;  %v777_v22 = vld [vmem:[%s3095_s13 + $0x10] sm:$0xff] }
 0x4a8   :  { %v589_v40 = vmul.f32 %v2530_v25, %v584_v39  ;;  %v2518_v25 = vpack.i.bf16 %v778_v23, %v777_v22  ;;  %v2449_v29 = vpack.c.bf16 %v778_v23, %v777_v22 }
 0x4a9   :  { %595 = vrot.lane.b32.xlu1 %v590_v38, %s2591_s9 }
 0x4aa   :  { %593 = vrot.lane.b32.xlu0 %v589_v40, %s2591_s9 }
 0x4ad   :  { %782 = vperm.xlu1 %2511, %v766_v19  }
 0x51b   :  { %v596_v42 = vpop.permute.xlu1 %595 }
 0x51c   :  { %v600_v20 = vadd.f32 %v2532_v34, %v596_v42  ;;  %v594_v43 = vpop.permute.xlu0 %593 }
 0x51d   :  { %v599_v44 = vadd.f32 %v2534_v24, %v594_v43 }
 0x51f   :  { %v2506_v46 = vpack.i.bf16 %v600_v20, %v599_v44  ;;  %v2892_v20 = vld [vmem:[%s3094_s12] sm:$0xf] }
 0x520   :  { %v822_v43 = vrot.slane %v2892_v20, %v2733_v17 }
 0x521   :  { %2507 = vrot.lane.b32.xlu0 %v2506_v46, %s2590_s26 }
 0x525   :  { %787 = vperm.xlu0 %2512, %v767_v47   ;;  %v828_v47 = vrot.slane %v2892_v20, %v2756_v21 }
 0x52c   :  { %v2848_v60 = vpop.permute.xlu1 %782 }
 0x593   :  { %v2508_v48 = vpop.permute.xlu0 %2507 }
 0x594   :  { %v2510_v49 = vunpack.i.h.bf16 %v2508_v48  ;;  %v2509_v50 = vunpack.i.l.bf16 %v2508_v48 }
 0x596   :  { %v2438_v51 = vpack.c.bf16 %v2510_v49, %v2509_v50 }
 0x598   :  { %2439 = vmatprep.subr.bf16.mxu1 %v2438_v51 }
 0x599   :  { %2441 = vmatpush3.bf16.msra.mxu1 %v2438_v51 }
 0x59a   :  { %2442 = vmatprep.subr.bf16.mxu1 %v2593_v53 }
 0x59c   :  { %2295 = vmatmul.mubr.msk.f32.vlgmr.msra.gmra.mrb[4].mxu1 %vm186_vm1, %v602_v52 }
 0x59d   :  { %2301 = vmatprep.mubr.msk.f32.mxu1 %vm2594_vm3, %v2587_v8 }
 0x5a4   :  { %v2846_v57 = vpop.permute.xlu0 %787 }
 0x66f   :  { %v2296_v56 = vpop.f32.mrb[4].mxu1 }
 0x670   :  { %v773_v58 = vadd.f32 %v2296_v56, %v771_v54  ;;  %v683_v59 = vpop.f32.mrb[5].mxu1 }
 0x671   :  { %v2443_v61 = vpack.c.bf16 %v2296_v56, %v683_v59  ;;  %v772_v62 = vadd.f32 %v770_v55, %v683_v59 }
 0x672   :  { %v2851_v63 = vmul.f32 %v2846_v57, %v773_v58 }
 0x673   :  { %v790_v0 = vmul.f32 %v2848_v60, %v772_v62  ;;  %2444 = vmatpush3.bf16.msra.mxu1 %v2443_v61 }
 0x674   :  { %v795_v1 = vsel %vm96_vm0, %v2851_v63, 0.0  ;;  %2446 = vmatprep.subr.bf16.mxu1 %v2445_v26 }
 0x675   :  { %796 = vadd.xlane.f32.xlu0 %v795_v1  ;;  %2323 = vmatprep.mubr.msk.f32.mxu0 %vm96_vm0, %v790_v0  ;;  %v792_v2 = vsel %vm96_vm0, %v790_v0, 0.0 }
 0x676   :  { %793 = vadd.xlane.f32.xlu1 %v792_v2  ;;  %2302 = vmatmul.mubr.msk.f32.vlgmr.msra.gmra.mrb[6].mxu1 %vm186_vm1, %v2880_v28 }
 0x677   :  { %2448 = vmatpush3.bf16.msra.mxu1 %v2445_v26 }
 0x678   :  { %2450 = vmatprep.subr.bf16.mxu1 %v2449_v29 }
 0x67b   :  { %2452 = vmatpush3.bf16.msra.mxu1 %v2449_v29 }
 0x67c   :  { %2326 = vmatprep.subr.mxu1 %v2587_v8 }
 0x702   :  { %v797_v3 = vpop.xlane.xlu0 %796 }
 0x703   :  { %v800_v4 = vmul.f32 0.03125, %v797_v3  ;;  %v794_v5 = vpop.xlane.xlu1 %793  ;;  %v2934_v3 = vld [vmem:[%s3087_s5] sm:$0xff] }
 0x704   :  { %v799_v6 = vmul.f32 0.03125, %v794_v5 }
 0x705   :  { %v802_v7 = vsub.f32 %v2851_v63, %v800_v4 }
 0x706   :  { %v801_v9 = vsub.f32 %v790_v0, %v799_v6 }
 0x707   :  { %v804_v10 = vmul.f32 %v802_v7, %v802_v7 }
 0x708   :  { %v803_v11 = vmul.f32 %v801_v9, %v801_v9 }
 0x709   :  { %v808_v12 = vsel %vm96_vm0, %v804_v10, 0.0 }
 0x70a   :  { %809 = vadd.xlane.f32.xlu0 %v808_v12  ;;  %v805_v14 = vsel %vm96_vm0, %v803_v11, 0.0 }
 0x70b   :  { %806 = vadd.xlane.f32.xlu1 %v805_v14 }
 0x71c   :  { %2514 = vrot.lane.b32.xlu1 %v2513_v18, %s2589_s10 }
 0x720   :  { %2519 = vrot.lane.b32.xlu0 %v2518_v25, %s2589_s10  ;;  %934 = vrot.lane.b32.xlu1 %v2153_v30, %s2589_s10 }
 0x749   :  { %v2913_v52 = vpop.f32.mrb[6].mxu1 }
 0x74a   :  { %v2303_v54 = vpop.f32.mrb[7].mxu1 }
 0x797   :  { %v810_v32 = vpop.xlane.xlu0 %809 }
 0x798   :  { %v812_v33 = vmul.f32 0.03125, %v810_v32  ;;  %v807_v34 = vpop.xlane.xlu1 %806 }
 0x799   :  { %v811_v24 = vmul.f32 0.03125, %v807_v34 }
 0x79a   :  { %v814_v27 = vadd.f32 1e-05, %v812_v33 }
 0x79b   :  { %v813_v31 = vadd.f32 1e-05, %v811_v24  ;;  %v2520_v35 = vpop.permute.xlu0 %2519 }
 0x79c   :  { %2535 = vrsqrt.f32 %v814_v27  ;;  %v2515_v36 = vpop.permute.xlu1 %2514  ;;  %v2522_v37 = vunpack.i.h.bf16 %v2520_v35  ;;  %v2521_v38 = vunpack.i.l.bf16 %v2520_v35 }
 0x79d   :  { %2537 = vrsqrt.f32 %v813_v31  ;;  %v2517_v39 = vunpack.i.h.bf16 %v2515_v36  ;;  %v2516_v40 = vunpack.i.l.bf16 %v2515_v36 }
 0x79e   :  { %v2457_v42 = vpack.c.bf16 %v2522_v37, %v2521_v38 }
 0x79f   :  { %v2453_v41 = vpack.c.bf16 %v2517_v39, %v2516_v40 }
 0x7a0   :  { %v935_v55 = vpop.permute.xlu1 %934 }
 0x7a1   :  { %2454 = vmatprep.subr.bf16.mxu0 %v2453_v41 }
 0x7a2   :  { %2456 = vmatpush3.bf16.msra.mxu0 %v2453_v41 }
 0x7a3   :  { %2458 = vmatprep.subr.bf16.mxu0 %v2457_v42 }
 0x7a6   :  { %v2536_v19 = vpop.eup %2535  ;;  %2460 = vmatpush3.bf16.msra.mxu0 %v2457_v42 }
 0x7a7   :  { %v2538_v44 = vpop.eup %2537  ;;  %v818_v45 = vmul.f32 %v2536_v19, %v802_v7  ;;  %2336 = vmatprep.subr.mxu0 %v2587_v8 }
 0x7a8   :  { %v817_v46 = vmul.f32 %v2538_v44, %v801_v9  ;;  %v2940_v9 = vld [vmem:[%s3087_s5 + $0x8] sm:$0xff]  ;;  %s2595_s5 = smov 80  }
 0x7a9   :  { %2324 = vmatmul.mubr.msk.f32.vlgmr.msra.gmra.mrb[6].mxu0 %vm96_vm0, %v2851_v63  ;;  %v824_v48 = vmul.f32 %v822_v43, %v818_v45 }
 0x7aa   :  { %v823_v49 = vmul.f32 %v822_v43, %v817_v46  ;;  %2338 = vmatprep.mubr.msk.f32.mxu0 %vm2594_vm3, %v2587_v8 }
 0x7ab   :  { %v2905_v51 = vadd.f32 %v828_v47, %v824_v48 }
 0x7ac   :  { %v2903_v50 = vadd.f32 %v828_v47, %v823_v49 }
 0x7ae   :  { %2312 = vmatprep.mubr.msk.f32.mxu1 %vm96_vm0, %v2903_v50 }
 0x7af   :  { %2313 = vmatmul.mubr.msk.f32.vlgmr.msra.gmra.mrb[8].mxu1 %vm96_vm0, %v2905_v51 }
 0x7b0   :  { %2328 = vmatprep.mubr.msk.f32.mxu1 %vm2594_vm3, %v2587_v8 }
 0x87c   :  { %v2325_v56 = vpop.f32.mrb[6].mxu0 }
 0x87d   :  { %v1009_v58 = vpop.f32.mrb[7].mxu0  ;;  %v2920_v0 = vadd.f32 %v2325_v56, %v935_v55 }
 0x87e   :  { %v2915_v59 = vadd.f32 %v1009_v58, %v935_v55 }
 0x880   :  { %2327 = vmatpush3.xpose.msk.msra.mxu1 %vm186_vm1, %v2915_v59 }
 0x881   :  { %2331 = vmatprep.subr.mxu1 %v2587_v8 }
 0x882   :  { %v2314_v61 = vpop.f32.mrb[8].mxu1 }
 0x883   :  { %v909_v62 = vpop.f32.mrb[9].mxu1  ;;  %v915_v1 = vadd.f32 %v2314_v61, %v2153_v30 }
 0x884   :  { %v910_v63 = vadd.f32 %v2153_v30, %v909_v62 }
 0x886   :  { %2329 = vmatmul.mubr.msk.f32.vlgmr.msra.gmra.mrb[10].mxu1 %vm186_vm1, %v910_v63 }
 0x887   :  { %2332 = vmatpush3.xpose.msk.msra.mxu1 %vm186_vm1, %v2920_v0  ;;  %2333 = vmatprep.mubr.msk.f32.mxu1 %vm2594_vm3, %v2587_v8 }
 0x888   :  { %2341 = vmatprep.subr.mxu1 %v2587_v8 }
 0x88a   :  { %2334 = vmatmul.mubr.msk.f32.vlgmr.msra.gmra.mrb[12].mxu1 %vm186_vm1, %v915_v1 }
 0x88b   :  { %2343 = vmatprep.mubr.msk.f32.mxu1 %vm2594_vm3, %v2587_v8 }
 0x959   :  { %v1090_v2 = vpop.f32.mrb[10].mxu1 }
 0x95a   :  { %v1170_v4 = vmul.f32 0.25, %v1090_v2  ;;  %v2330_v5 = vpop.f32.mrb[11].mxu1 }
 0x95c   :  { %v1172_v6 = vadd.f32 %v1170_v4, %v2934_v3 }
 0x95d   :  { %v1166_v7 = vpop.f32.mrb[12].mxu1 }
 0x95e   :  { %v1171_v10 = vmul.f32 0.25, %v1166_v7  ;;  %v2335_v11 = vpop.f32.mrb[13].mxu1  ;;  %v1175_v12 = vsel %vm1174_vm4, %v1172_v6, -inf }
 0x95f   :  { %1176 = vmax.xlane.f32.xlu1 %v1175_v12 }
 0x960   :  { %v1173_v14 = vadd.f32 %v1171_v10, %v2940_v9 }
 0x962   :  { %v1178_v15 = vsel %vm1174_vm4, %v1173_v14, -inf }
 0x963   :  { %1179 = vmax.xlane.f32.xlu0 %v1178_v15 }
 0x970   :  { %1273 = vrot.lane.b32.xlu1 %v2920_v0, %s2589_s10 }
 0x974   :  { %1351 = vrot.lane.b32.xlu1 %v2915_v59, %s2588_s2 }
 0x979   :  { %1197 = vrot.lane.b32.xlu0 %v2915_v59, %s2589_s10 }
 0x9ec   :  { %v1177_v16 = vpop.xlane.xlu1 %1176 }
 0x9ed   :  { %v1181_v18 = vsub.f32 %v1172_v6, %v1177_v16 }
 0x9ef   :  { %v1183_v22 = vmul.f32 1.442695, %v1181_v18 }
 0x9f0   :  { %v1274_v23 = vpop.permute.xlu1 %1273  ;;  %v1180_v25 = vpop.xlane.xlu0 %1179 }
 0x9f1   :  { %2539 = vpow2.f32 %v1183_v22  ;;  %v1182_v26 = vsub.f32 %v1173_v14, %v1180_v25  ;;  %2342 = vmatpush3.msra.mxu1 %v1274_v23 }
 0x9f2   :  { %2351 = vmatprep.subr.mxu1 %v2587_v8 }
 0x9f3   :  { %v1185_v29 = vmul.f32 1.442695, %v1182_v26  ;;  %v1695_v26 = vld [vmem:[%s3097_s15 + $0x10] sm:$0xff] }
 0x9f4   :  { %v1198_v30 = vpop.permute.xlu0 %1197  ;;  %v1352_v27 = vpop.permute.xlu1 %1351 }
 0x9f5   :  { %2541 = vpow2.f32 %v1185_v29  ;;  %2337 = vmatpush3.msra.mxu0 %v1198_v30  ;;  %v1696_v29 = vld [vmem:[%s3097_s15 + $0x18] sm:$0xff] }
 0x9f6   :  { %2346 = vmatprep.subr.mxu0 %v2587_v8  ;;  %v2465_v30 = vpack.c.bf16 %v1696_v29, %v1695_v26 }
 0x9fb   :  { %v2540_v32 = vpop.eup %2539 }
 0x9fc   :  { %v1187_v33 = vsel %vm1174_vm4, %v2540_v32, 0.0 }
 0x9fd   :  { %1188 = vadd.xlane.f32.xlu0 %v1187_v33 }
 0x9ff   :  { %v2542_v34 = vpop.eup %2541 }
 0xa00   :  { %v1190_v24 = vsel %vm1174_vm4, %v2542_v34, 0.0 }
 0xa01   :  { %1191 = vadd.xlane.f32.xlu1 %v1190_v24 }
 0xa12   :  { %1349 = vrot.lane.b32.xlu1 %v910_v63, %s2588_s2 }
 0xa13   :  { %1429 = vrot.lane.b32.xlu0 %v2920_v0, %s2588_s2 }
 0xa17   :  { %1427 = vrot.lane.b32.xlu0 %v915_v1, %s2588_s2 }
 0xa8a   :  { %v1189_v31 = vpop.xlane.xlu0 %1188 }
 0xa8b   :  { %2543 = vrcp.f32 %v1189_v31 }
 0xa8e   :  { %v1192_v35 = vpop.xlane.xlu1 %1191  ;;  %v1430_v39 = vpop.permute.xlu0 %1429 }
 0xa8f   :  { %2545 = vrcp.f32 %v1192_v35 }
 0xa92   :  { %v1350_v41 = vpop.permute.xlu1 %1349  ;;  %v1428_v42 = vpop.permute.xlu0 %1427 }
 0xa95   :  { %v2544_v36 = vpop.eup %2543 }
 0xa96   :  { %v1195_v37 = vmul.f32 %v2544_v36, %v2540_v32 }
 0xa98   :  { %2339 = vmatmul.mubr.msk.f32.vlgmr.msra.gmra.mrb[8].mxu0 %vm1174_vm4, %v1195_v37  ;;  %v2170_v37 = vld [vmem:[%s3098_s16] ss:$0 sm:$0xff] }
 0xa99   :  { %v2546_v38 = vpop.eup %2545  ;;  %2347 = vmatpush3.xpose.msk.msra.mxu0 %vm186_vm1, %v1352_v27  ;;  %2348 = vmatprep.mubr.msk.f32.mxu0 %vm2594_vm3, %v2587_v8 }
 0xa9a   :  { %v1196_v40 = vmul.f32 %v2546_v38, %v2542_v34  ;;  %2356 = vmatprep.subr.mxu0 %v2587_v8 }
 0xa9c   :  { %2344 = vmatmul.mubr.msk.f32.vlgmr.msra.gmra.mrb[14].mxu1 %vm1174_vm4, %v1196_v40  ;;  %2349 = vmatmul.mubr.msk.f32.vlgmr.msra.gmra.mrb[10].mxu0 %vm186_vm1, %v1350_v41 }
 0xa9d   :  { %2352 = vmatpush3.xpose.msk.msra.mxu1 %vm186_vm1, %v1430_v39  ;;  %2353 = vmatprep.mubr.msk.f32.mxu1 %vm2594_vm3, %v2587_v8 }
 0xa9e   :  { %2361 = vmatprep.subr.mxu1 %v2587_v8  ;;  %2358 = vmatprep.mubr.msk.f32.mxu0 %vm2594_vm3, %v2587_v8 }
 0xaa0   :  { %2354 = vmatmul.mubr.msk.f32.vlgmr.msra.gmra.mrb[16].mxu1 %vm186_vm1, %v1428_v42 }
 0xaa1   :  { %2363 = vmatprep.mubr.msk.f32.mxu1 %vm2594_vm3, %v2587_v8 }
 0xb6b   :  { %v2975_v43 = vpop.f32.mrb[8].mxu0 }
 0xb6c   :  { %v2340_v19 = vpop.f32.mrb[9].mxu0 }
 0xb6f   :  { %v2977_v44 = vpop.f32.mrb[14].mxu1  ;;  %v1423_v45 = vpop.f32.mrb[10].mxu0 }
 0xb70   :  { %v1505_v46 = vmul.f32 0.25, %v1423_v45  ;;  %v2345_v47 = vpop.f32.mrb[15].mxu1  ;;  %v2350_v48 = vpop.f32.mrb[11].mxu0 }
 0xb72   :  { %v1507_v49 = vadd.f32 %v1505_v46, %v2934_v3 }
 0xb73   :  { %v1501_v54 = vpop.f32.mrb[16].mxu1 }
 0xb74   :  { %v1506_v55 = vmul.f32 0.25, %v1501_v54  ;;  %v2355_v56 = vpop.f32.mrb[17].mxu1  ;;  %v1509_v58 = vsel %vm1174_vm4, %v1507_v49, -inf }
 0xb75   :  { %1510 = vmax.xlane.f32.xlu1 %v1509_v58 }
 0xb76   :  { %v1508_v61 = vadd.f32 %v1506_v55, %v2940_v9 }
 0xb78   :  { %v1512_v62 = vsel %vm1174_vm4, %v1508_v61, -inf }
 0xb79   :  { %1513 = vmax.xlane.f32.xlu0 %v1512_v62 }
 0xc02   :  { %v1511_v63 = vpop.xlane.xlu1 %1510 }
 0xc03   :  { %v1515_v1 = vsub.f32 %v1507_v49, %v1511_v63  ;;  %v1827_v63 = vld [vmem:[%s3099_s17 + $0x10] sm:$0xff] }
 0xc05   :  { %v1517_v2 = vmul.f32 1.442695, %v1515_v1  ;;  %v1828_v1 = vld [vmem:[%s3099_s17 + $0x18] sm:$0xff] }
 0xc06   :  { %v1514_v4 = vpop.xlane.xlu0 %1513 }
 0xc07   :  { %2547 = vpow2.f32 %v1517_v2  ;;  %v1516_v5 = vsub.f32 %v1508_v61, %v1514_v4  ;;  %v1826_v61 = vld [vmem:[%s3099_s17 + $0x8] sm:$0xff]  ;;  %v2473_v2 = vpack.c.bf16 %v1828_v1, %v1827_v63  ;;  %v1829_v4 = vld [vmem:[%s3099_s17 + $0x20] sm:$0xff] }
 0xc09   :  { %v1519_v6 = vmul.f32 1.442695, %v1516_v5  ;;  %v1830_v5 = vld [vmem:[%s3099_s17 + $0x28] sm:$0xff] }
 0xc0b   :  { %2549 = vpow2.f32 %v1519_v6  ;;  %v2477_v6 = vpack.c.bf16 %v1830_v5, %v1829_v4 }
 0xc11   :  { %v2548_v3 = vpop.eup %2547 }
 0xc12   :  { %v1521_v7 = vsel %vm1174_vm4, %v2548_v3, 0.0 }
 0xc13   :  { %1522 = vadd.xlane.f32.xlu0 %v1521_v7 }
 0xc15   :  { %v2550_v10 = vpop.eup %2549 }
 0xc16   :  { %v1524_v11 = vsel %vm1174_vm4, %v2550_v10, 0.0 }
 0xc17   :  { %1525 = vadd.xlane.f32.xlu1 %v1524_v11 }
 0xc28   :  { %1607 = vrot.lane.b32.xlu1 %v2920_v0, %s2595_s5  ;;  %v1694_v0 = vld [vmem:[%s3097_s15 + $0x8] sm:$0xff] }
 0xc29   :  { %1531 = vrot.lane.b32.xlu0 %v2915_v59, %s2595_s5  ;;  %v1693_v59 = vld [vmem:[%s3097_s15] sm:$0xff] }
 0xc2a   :  { %v2461_v25 = vpack.c.bf16 %v1694_v0, %v1693_v59 }
 0xca0   :  { %v1523_v9 = vpop.xlane.xlu0 %1522 }
 0xca1   :  { %2551 = vrcp.f32 %v1523_v9 }
 0xca4   :  { %v1526_v12 = vpop.xlane.xlu1 %1525  ;;  %v1532_v14 = vpop.permute.xlu0 %1531 }
 0xca5   :  { %2553 = vrcp.f32 %v1526_v12  ;;  %2357 = vmatpush3.msra.mxu0 %v1532_v14  ;;  %v1821_v14 = vsub.s32 3, %v2723_v13 }
 0xca6   :  { %2462 = vmatprep.subr.bf16.mxu0 %v2461_v25 }
 0xca7   :  { %v1822_v59 = vrot.slane %v2892_v20, %v1821_v14 }
 0xca8   :  { %v1608_v15 = vpop.permute.xlu1 %1607 }
 0xca9   :  { %2362 = vmatpush3.msra.mxu1 %v1608_v15 }
 0xcab   :  { %v2552_v16 = vpop.eup %2551 }
 0xcac   :  { %v1529_v18 = vmul.f32 %v2552_v16, %v2548_v3 }
 0xcae   :  { %2359 = vmatmul.mubr.msk.f32.vlgmr.msra.gmra.mrb[12].mxu0 %vm1174_vm4, %v1529_v18 }
 0xcaf   :  { %v2554_v22 = vpop.eup %2553  ;;  %2464 = vmatpush3.bf16.msra.mxu0 %v2461_v25 }
 0xcb0   :  { %v1530_v23 = vmul.f32 %v2554_v22, %v2550_v10  ;;  %2466 = vmatprep.subr.bf16.mxu0 %v2465_v30 }
 0xcb2   :  { %2364 = vmatmul.mubr.msk.f32.vlgmr.msra.gmra.mrb[18].mxu1 %vm1174_vm4, %v1530_v23 }
 0xcb3   :  { %2468 = vmatpush3.bf16.msra.mxu0 %v2465_v30  ;;  %v1832_v30 = vld [vmem:[%s3099_s17 + $0x38] sm:$0xff] }
 0xcb4   :  { %2478 = vmatprep.subr.bf16.mxu0 %v2477_v6 }
 0xd81   :  { %v1603_v32 = vpop.f32.mrb[12].mxu0 }
 0xd82   :  { %1685 = vrot.lane.b32.xlu1 %v1603_v32, %s2596_s8  ;;  %v2360_v33 = vpop.f32.mrb[13].mxu0  ;;  %v1833_v32 = vld [vmem:[%s3100_s18] sm:$0x3] }
 0xd83   :  { %v1837_v33 = vrot.slane %v1833_v32, %v2733_v17 }
 0xd85   :  { %v1679_v34 = vpop.f32.mrb[18].mxu1 }
 0xd86   :  { %1687 = vrot.lane.b32.xlu0 %v1679_v34, %s2596_s8  ;;  %v2365_v24 = vpop.f32.mrb[19].mxu1 }
 0xdf4   :  { %v1686_v27 = vpop.permute.xlu1 %1685 }
 0xdf5   :  { %v1691_v31 = vsel %vm186_vm1, %v2975_v43, %v1686_v27 }
 0xdf6   :  { %2374 = vmatprep.mubr.msk.f32.mxu0 %vm96_vm0, %v1691_v31 }
 0xdf8   :  { %v1688_v35 = vpop.permute.xlu0 %1687 }
 0xdf9   :  { %v1692_v36 = vsel %vm186_vm1, %v2977_v44, %v1688_v35 }
 0xdfa   :  { %2375 = vmatmul.mubr.msk.f32.vlgmr.msra.gmra.mrb[14].mxu0 %vm96_vm0, %v1692_v36  ;;  %v1924_v36 = vrot.slane %v1833_v32, %v2756_v21 }
 0xdfb   :  { %2480 = vmatpush3.bf16.msra.mxu0 %v2477_v6 }
 0xecd   :  { %v2376_v38 = vpop.f32.mrb[14].mxu0 }
 0xece   :  { %v1782_v39 = vadd.f32 %v2376_v38, %v2170_v37  ;;  %v1776_v40 = vpop.f32.mrb[15].mxu0 }
 0xecf   :  { %v1777_v41 = vadd.f32 %v2170_v37, %v1776_v40 }
 0xed0   :  { %v1786_v42 = vadd.f32 %v1782_v39, %v2905_v51 }
 0xed1   :  { %v1785_v43 = vadd.f32 %v1777_v41, %v2903_v50  ;;  %v1825_v50 = vld [vmem:[%s3099_s17] sm:$0xff] }
 0xed2   :  { %v1790_v19 = vsel %vm96_vm0, %v1786_v42, 0.0  ;;  %v2469_v62 = vpack.c.bf16 %v1826_v61, %v1825_v50 }
 0xed3   :  { %1791 = vadd.xlane.f32.xlu0 %v1790_v19  ;;  %v1787_v45 = vsel %vm96_vm0, %v1785_v43, 0.0 }
 0xed4   :  { %1788 = vadd.xlane.f32.xlu1 %v1787_v45  ;;  %2470 = vmatprep.subr.bf16.mxu1 %v2469_v62 }
 0xed5   :  { %2472 = vmatpush3.bf16.msra.mxu1 %v2469_v62 }
 0xed6   :  { %2474 = vmatprep.subr.bf16.mxu1 %v2473_v2 }
 0xed9   :  { %2476 = vmatpush3.bf16.msra.mxu1 %v2473_v2  ;;  %v2010_v2 = vld [vmem:[%s3093_s11] sm:$0x3]  ;;  %s2130_s11 = sshll.u32 %s2597_s3, 4  ;;  %s2131_s11 = int_to_ptr.vmem [resolvable:$true] %s2130_s11 }
 0xeda   :  { %2485 = vmatprep.subr.bf16.mxu1 %v2593_v53  ;;  %v1815_v53 = vsub.s32 2, %v2723_v13  ;;  %v1831_v13 = vld [vmem:[%s3099_s17 + $0x30] sm:$0xff]  ;;  %v2040_v4 = vrot.slane %v2010_v2, %v2733_v17  ;;  %v2120_v17 = vmul.f32 0.6, %v2913_v52  ;;  %s2563_s27 = scalar_lea.vmem %s2131_s11, 32  ;;  %p2568_p1 = scmp.lt.s32.totalorder %s2131_s11, %s2131_s11 }
 0xedb   :  { %p2564_p0 = scmp.ne.s32.totalorder %s2131_s11, %s2563_s27  ;;  %p2569_p2 = scmp.lt.s32.totalorder %s2563_s27, %s2563_s27 }
 0xedc   :  { %v1816_v15 = vrot.slane %v2892_v20, %v1815_v53  ;;  %v2481_v20 = vpack.c.bf16 %v1832_v30, %v1831_v13 }
 0xedd   :  { %p2570_p3 = por %p2569_p2, %p2568_p1 }
 0xede   :  { %2482 = vmatprep.subr.bf16.mxu0 %v2481_v20 }
 0xedf   :  { %2484 = vmatpush3.bf16.msra.mxu0 %v2481_v20  ;;  %p2571_p4 = pnand %p2570_p3, %p2564_p0 }
 0xf60   :  { %v1792_v44 = vpop.xlane.xlu0 %1791 }
 0xf61   :  { %v1794_v46 = vmul.f32 0.03125, %v1792_v44  ;;  %v1789_v47 = vpop.xlane.xlu1 %1788 }
 0xf62   :  { %v1793_v48 = vmul.f32 0.03125, %v1789_v47 }
 0xf63   :  { %v1796_v49 = vsub.f32 %v1786_v42, %v1794_v46 }
 0xf64   :  { %v1795_v54 = vsub.f32 %v1785_v43, %v1793_v48 }
 0xf65   :  { %v1798_v55 = vmul.f32 %v1796_v49, %v1796_v49 }
 0xf66   :  { %v1797_v56 = vmul.f32 %v1795_v54, %v1795_v54 }
 0xf67   :  { %v1802_v58 = vsel %vm96_vm0, %v1798_v55, 0.0 }
 0xf68   :  { %1803 = vadd.xlane.f32.xlu1 %v1802_v58  ;;  %v1799_v51 = vsel %vm96_vm0, %v1797_v56, 0.0 }
 0xf69   :  { %1800 = vadd.xlane.f32.xlu0 %v1799_v51 }
 0xff5   :  { %v1804_v3 = vpop.xlane.xlu1 %1803 }
 0xff6   :  { %v1806_v7 = vmul.f32 0.03125, %v1804_v3  ;;  %v1801_v10 = vpop.xlane.xlu0 %1800 }
 0xff7   :  { %v1805_v11 = vmul.f32 0.03125, %v1801_v10 }
 0xff8   :  { %v1808_v9 = vadd.f32 1e-05, %v1806_v7  ;;  %v2046_v7 = vrot.slane %v2010_v2, %v2756_v21 }
 0xff9   :  { %v1807_v12 = vadd.f32 1e-05, %v1805_v11 }
 0xffa   :  { %2555 = vrsqrt.f32 %v1808_v9 }
 0xffb   :  { %2557 = vrsqrt.f32 %v1807_v12 }
0x1004   :  { %v2556_v16 = vpop.eup %2555 }
0x1005   :  { %v2558_v18 = vpop.eup %2557  ;;  %v1812_v22 = vmul.f32 %v2556_v16, %v1796_v49 }
0x1006   :  { %v1811_v23 = vmul.f32 %v2558_v18, %v1795_v54 }
0x1007   :  { %v1818_v0 = vmul.f32 %v1816_v15, %v1812_v22 }
0x1008   :  { %v1817_v25 = vmul.f32 %v1816_v15, %v1811_v23 }
0x1009   :  { %v1824_v29 = vadd.f32 %v1822_v59, %v1818_v0 }
0x100a   :  { %v1823_v26 = vadd.f32 %v1822_v59, %v1817_v25 }
0x100c   :  { %2385 = vmatprep.mubr.msk.f32.mxu1 %vm96_vm0, %v1823_v26 }
0x100d   :  { %2386 = vmatmul.mubr.msk.f32.vlgmr.msra.gmra.mrb[20].mxu1 %vm96_vm0, %v1824_v29 }
0x100e   :  { %2403 = vmatprep.mubr.msk.f32.mxu1 %vm2594_vm3, %v2587_v8 }
0x10e0   :  { %v2387_v34 = vpop.f32.mrb[20].mxu1 }
0x10e1   :  { %v1916_v24 = vadd.f32 %v2387_v34, %v1837_v33  ;;  %v1910_v8 = vpop.f32.mrb[21].mxu1 }
0x10e2   :  { %v1911_v27 = vadd.f32 %v1910_v8, %v1837_v33 }
0x10e3   :  { %v1920_v35 = vmax.f32 %v1916_v24, 0.0 }
0x10e4   :  { %v1919_v31 = vmax.f32 %v1911_v27, 0.0 }
0x10e6   :  { %2396 = vmatprep.mubr.msk.f32.mxu0 %vm96_vm0, %v1919_v31 }
0x10e7   :  { %2397 = vmatmul.mubr.msk.f32.vlgmr.msra.gmra.mrb[16].mxu0 %vm96_vm0, %v1920_v35 }
0x11ba   :  { %v2398_v37 = vpop.f32.mrb[16].mxu0 }
0x11bb   :  { %v2003_v38 = vadd.f32 %v2398_v37, %v1924_v36  ;;  %v1997_v39 = vpop.f32.mrb[17].mxu0 }
0x11bc   :  { %v1998_v40 = vadd.f32 %v1997_v39, %v1924_v36 }
0x11bd   :  { %v2007_v41 = vadd.f32 %v2003_v38, %v1824_v29 }
0x11be   :  { %v2006_v42 = vadd.f32 %v1998_v40, %v1823_v26 }
0x11bf   :  { %v2009_v43 = vmul.f32 %v2007_v41, %v2846_v57 }
0x11c0   :  { %v2008_v19 = vmul.f32 %v2006_v42, %v2848_v60 }
0x11c1   :  { %v2014_v45 = vsel %vm96_vm0, %v2009_v43, 0.0 }
0x11c2   :  { %2015 = vadd.xlane.f32.xlu1 %v2014_v45  ;;  %v2011_v44 = vsel %vm96_vm0, %v2008_v19, 0.0 }
0x11c3   :  { %2012 = vadd.xlane.f32.xlu0 %v2011_v44 }
0x124f   :  { %v2016_v46 = vpop.xlane.xlu1 %2015 }
0x1250   :  { %v2018_v47 = vmul.f32 0.03125, %v2016_v46  ;;  %v2013_v48 = vpop.xlane.xlu0 %2012 }
0x1251   :  { %v2017_v49 = vmul.f32 0.03125, %v2013_v48 }
0x1252   :  { %v2020_v54 = vsub.f32 %v2009_v43, %v2018_v47 }
0x1253   :  { %v2019_v55 = vsub.f32 %v2008_v19, %v2017_v49 }
0x1254   :  { %v2022_v56 = vmul.f32 %v2020_v54, %v2020_v54 }
0x1255   :  { %v2021_v58 = vmul.f32 %v2019_v55, %v2019_v55 }
0x1256   :  { %v2026_v51 = vsel %vm96_vm0, %v2022_v56, 0.0 }
0x1257   :  { %2027 = vadd.xlane.f32.xlu1 %v2026_v51  ;;  %v2023_v57 = vsel %vm96_vm0, %v2021_v58, 0.0 }
0x1258   :  { %2024 = vadd.xlane.f32.xlu0 %v2023_v57 }
0x12e4   :  { %v2028_v60 = vpop.xlane.xlu1 %2027 }
0x12e5   :  { %v2030_v50 = vmul.f32 0.03125, %v2028_v60  ;;  %v2025_v61 = vpop.xlane.xlu0 %2024 }
0x12e6   :  { %v2029_v62 = vmul.f32 0.03125, %v2025_v61 }
0x12e7   :  { %v2032_v63 = vadd.f32 1e-05, %v2030_v50 }
0x12e8   :  { %v2031_v1 = vadd.f32 1e-05, %v2029_v62 }
0x12e9   :  { %2559 = vrsqrt.f32 %v2032_v63 }
0x12ea   :  { %2561 = vrsqrt.f32 %v2031_v1 }
0x12f3   :  { %v2560_v5 = vpop.eup %2559 }
0x12f4   :  { %v2562_v6 = vpop.eup %2561  ;;  %v2036_v3 = vmul.f32 %v2560_v5, %v2020_v54 }
0x12f5   :  { %v2035_v10 = vmul.f32 %v2562_v6, %v2019_v55 }
0x12f6   :  { %v2042_v11 = vmul.f32 %v2040_v4, %v2036_v3 }
0x12f7   :  { %v2041_v9 = vmul.f32 %v2040_v4, %v2035_v10 }
0x12f8   :  { %v2048_v12 = vadd.f32 %v2046_v7, %v2042_v11 }
0x12f9   :  { %v2047_v53 = vadd.f32 %v2046_v7, %v2041_v9 }
0x12fb   :  { %v2486_v14 = vpack.c.bf16 %v2048_v12, %v2047_v53 }
0x12fd   :  { %2487 = vmatpush3.bf16.msra.mxu1 %v2486_v14 }
0x1300   :  { %2404 = vmatmul.mubr.msk.f32.vlgmr.msra.gmra.mrb[22].mxu1 %vm186_vm1, %v2880_v28 }
0x13d3   :  { %v2115_v15 = vpop.f32.mrb[22].mxu1 }
0x13d4   :  { %v2119_v16 = vmul.f32 0.4, %v2115_v15  ;;  %v2405_v18 = vpop.f32.mrb[23].mxu1 }
0x13d6   :  { %v2121_v22 = vadd.f32 %v2120_v17, %v2119_v16 }
0x13d8   :  { %2123 = vst.msk [vmem:[#allocation2] sm:$0x3] %vm2122_vm5, %v2121_v22 }
0x13d9   :  { %2574 = shalt.err (!%p2571_p4)
}
0x13da   :  { %s2575_s29 = scalar_lea.hbm %s3101_s19, 32 }
0x13db   :  { %p2576_p5 = scmp.ne.s32.totalorder %s3101_s19, %s2575_s29  ;;  %p2579_p6 = scmp.lt.u32.totalorder %s2575_s29, %s3101_s19 }
0x13dd   :  { %p2581_p7 = pnand %p2579_p6, %p2576_p5 }
0x13df   :  { %2584 = shalt.err (!%p2581_p7)
}
0x13e0   :  { %2133 = dma.vmem_to_hbm [thread:$0]  %s2131_s11, 32, %s3101_s19, [#allocation3]  }
0x13e1   :  { %2585 = dma.done.wait [#allocation3], 32  }
0x13e2   :  { %2586 = vsyncadd [#allocation3], 4294967264 }
0x13e3   :  { %2137 = vsyncpa [#allocation3], 1 }

</bundles_post_ra>
